<compile_context>
chip_gen: v5e
topology: v5e:2x2
jax: 0.10.0
libtpu: 0.0.40
codegen_flags: <defaults>
</compile_context>

<pallas_src>
import jax
import jax.numpy as jnp
import numpy as np
from jax.experimental import pallas as pl
from jax.experimental.pallas import tpu as pltpu

TEMPERATURE = 0.95            # default of the ContrastiveLoss used by DILCR training
_GELU_C = 0.7978845608028654  # sqrt(2/pi)


def _gelu(x):
    # TODO(synk): torch nn.GELU() defaults to the exact erf form; the tanh
    # approximation is used here because erf has no guaranteed Mosaic lowering.
    return 0.5 * x * (1.0 + jnp.tanh(_GELU_C * (x + 0.044715 * x * x * x)))


def _vmem_specs(n):
    return [pl.BlockSpec(memory_space=pltpu.MemorySpace.VMEM) for _ in range(n)]


def _dot(a, b):
    return jnp.dot(a, b, preferred_element_type=jnp.float32)


# ----------------------------------------------------------------------------
# Parameter init (raw per-view params for the reference) + packing (for kernel)
# ----------------------------------------------------------------------------
def _init_linear(key, fan_in, fan_out):
    kw, kb = jax.random.split(key)
    w = jax.random.normal(kw, (fan_in, fan_out), jnp.float32) * float(np.sqrt(2.0 / fan_in))
    b = 0.05 * jax.random.normal(kb, (1, fan_out), jnp.float32)
    return w, b


def _block_diag(mats):
    rows = sum(m.shape[0] for m in mats)
    cols = sum(m.shape[1] for m in mats)
    out = jnp.zeros((rows, cols), jnp.float32)
    r = c = 0
    for m in mats:
        out = out.at[r:r + m.shape[0], c:c + m.shape[1]].set(m)
        r += m.shape[0]
        c += m.shape[1]
    return out


def _slab_offsets(cfg):
    V = len(cfg['in_dims'])
    sum_in = sum(cfg['in_dims'])
    pd, cd = cfg['peculiar_dim'], cfg['common_dim']
    md, cvd = cfg['mu_logvar_dim'], cfg['cluster_var_dim']
    fdim = 3 * cd
    offs = {}
    o = 0
    offs['rec'] = o;  o += sum_in
    offs['pec'] = o;  o += V * pd
    offs['com'] = o;  o += V * cd
    offs['fus'] = o;  o += fdim
    offs['clu'] = o;  o += cvd
    offs['mu'] = o;   o += V * md
    offs['pred'] = o; o += 1
    return offs, o


def _pack_dilcr_params(params, cfg):
    """All weight packing / merging / transposes hoisted out of the step path."""
    in_dims = cfg['in_dims']
    ed = list(cfg['encoder_dim'])
    V = len(in_dims)
    fd, pd, cd = cfg['feature_dim'], cfg['peculiar_dim'], cfg['common_dim']
    md, cvd = cfg['mu_logvar_dim'], cfg['cluster_var_dim']
    n_mlp = len(ed) + 1
    pk = {}

    # encoder layer 0: per-view "wide" weight (in_dims[v], V*ed0) with W_v in
    # column block v; h0 = gelu(sum_v x_v @ wide_v + b_cat) -- no concat needed.
    ed0 = ed[0]
    pk['enc_l0_w'] = []
    for v in range(V):
        w_v = params['enc'][v]['mlp'][0][0]
        wide = jnp.zeros((in_dims[v], V * ed0), jnp.float32)
        wide = wide.at[:, v * ed0:(v + 1) * ed0].set(w_v)
        pk['enc_l0_w'].append(wide)
    pk['enc_l0_b'] = jnp.concatenate(
        [params['enc'][v]['mlp'][0][1] for v in range(V)], axis=1)

    # remaining encoder MLP layers: block-diagonal across views
    pk['enc_mlp'] = []
    for j in range(1, n_mlp):
        pk['enc_mlp'].append((
            _block_diag([params['enc'][v]['mlp'][j][0] for v in range(V)]),
            jnp.concatenate([params['enc'][v]['mlp'][j][1] for v in range(V)], axis=1)))

    # pec + com heads share input h: one packed matmul producing [pec_all | com_all]
    head_w = jnp.zeros((V * fd, V * pd + V * cd), jnp.float32)
    head_b = jnp.zeros((1, V * pd + V * cd), jnp.float32)
    for v in range(V):
        wp, bp = params['enc'][v]['pec']
        wc, bc = params['enc'][v]['com']
        head_w = head_w.at[v * fd:(v + 1) * fd, v * pd:(v + 1) * pd].set(wp)
        head_w = head_w.at[v * fd:(v + 1) * fd,
                           V * pd + v * cd:V * pd + (v + 1) * cd].set(wc)
        head_b = head_b.at[:, v * pd:(v + 1) * pd].set(bp)
        head_b = head_b.at[:, V * pd + v * cd:V * pd + (v + 1) * cd].set(bc)
    pk['head_w'], pk['head_b'] = head_w, head_b

    # mu head: block-diagonal over views (input = packed peculiars)
    pk['mu_w'] = _block_diag([params['enc'][v]['mu'][0] for v in range(V)])
    pk['mu_b'] = jnp.concatenate([params['enc'][v]['mu'][1] for v in range(V)], axis=1)

    # fusion network (single net, unchanged)
    pk['fus'] = params['fus']

    # fusion_to_cluster: merge the two back-to-back bias-linear pairs
    (wc0, bc0), (wc1, bc1), (wc2, bc2), (wc3, bc3) = params['clu']
    pk['clu01_w'] = jnp.dot(wc0, wc1, precision='highest')
    pk['clu01_b'] = jnp.dot(bc0, wc1, precision='highest') + bc1
    pk['clu23_w'] = jnp.dot(wc2, wc3, precision='highest')
    pk['clu23_b'] = jnp.dot(bc2, wc3, precision='highest') + bc3

    # classification head (wk1 transposed at init -> lane-major row for VPU dot)
    (wk0, bk0), (wk1, bk1) = params['cls']
    pk['cls0_w'], pk['cls0_b'] = wk0, bk0
    pk['cls1_wt'], pk['cls1_b'] = jnp.transpose(wk1), bk1

    # decoder layer 0: z part block-diag, shared cluster part stacked horizontally
    ze = ed[-1]
    pk['dec0_wz'] = _block_diag([params['dec'][v]['l0'][0][:md] for v in range(V)])
    pk['dec0_wc'] = jnp.concatenate([params['dec'][v]['l0'][0][md:] for v in range(V)], axis=1)
    pk['dec0_b'] = jnp.concatenate([params['dec'][v]['l0'][1] for v in range(V)], axis=1)
    del ze

    # decoder mid layers / output layer: block-diagonal across views
    pk['dec_mid'] = []
    for j in range(len(ed) - 1):
        pk['dec_mid'].append((
            _block_diag([params['dec'][v]['mid'][j][0] for v in range(V)]),
            jnp.concatenate([params['dec'][v]['mid'][j][1] for v in range(V)], axis=1)))
    pk['dec_out_w'] = _block_diag([params['dec'][v]['out'][0] for v in range(V)])
    pk['dec_out_b'] = jnp.concatenate([params['dec'][v]['out'][1] for v in range(V)], axis=1)
    return pk


def init_dilcr_params(key, in_dims, encoder_dim, feature_dim, peculiar_dim,
                      common_dim, mu_logvar_dim, cluster_var_dim, up_and_down_dim):
    V = len(in_dims)
    counter = [0]

    def nk():
        counter[0] += 1
        return jax.random.fold_in(key, counter[0])

    params = {'enc': [], 'dec': []}
    for v in range(V):
        dims = [in_dims[v]] + list(encoder_dim) + [feature_dim]
        params['enc'].append({
            'mlp': [_init_linear(nk(), dims[i], dims[i + 1]) for i in range(len(dims) - 1)],
            'pec': _init_linear(nk(), feature_dim, peculiar_dim),
            'mu': _init_linear(nk(), peculiar_dim, mu_logvar_dim),
            'com': _init_linear(nk(), feature_dim, common_dim),
        })
    fusion_dim = 3 * common_dim
    params['fus'] = [_init_linear(nk(), 3 * common_dim, 128),
                     _init_linear(nk(), 128, fusion_dim)]
    params['clu'] = [_init_linear(nk(), fusion_dim, up_and_down_dim),
                     _init_linear(nk(), up_and_down_dim, 128),
                     _init_linear(nk(), 128, up_and_down_dim),
                     _init_linear(nk(), up_and_down_dim, cluster_var_dim)]
    params['cls'] = [_init_linear(nk(), cluster_var_dim, 128),
                     _init_linear(nk(), 128, 1)]
    pc_dim = mu_logvar_dim + cluster_var_dim
    for v in range(V):
        params['dec'].append({
            'l0': _init_linear(nk(), pc_dim, encoder_dim[-1]),
            'mid': [_init_linear(nk(), encoder_dim[-(j + 1)], encoder_dim[-(j + 2)])
                    for j in range(len(encoder_dim) - 1)],
            'out': _init_linear(nk(), encoder_dim[0], in_dims[v]),
        })

    cfg = {'in_dims': list(in_dims), 'encoder_dim': list(encoder_dim),
           'feature_dim': feature_dim, 'peculiar_dim': peculiar_dim,
           'common_dim': common_dim, 'mu_logvar_dim': mu_logvar_dim,
           'cluster_var_dim': cluster_var_dim, 'up_and_down_dim': up_and_down_dim}
    cfg['offsets'], cfg['slab_width'] = _slab_offsets(cfg)
    params['cfg'] = cfg
    params['packed'] = _pack_dilcr_params(params, cfg)
    return params


# ----------------------------------------------------------------------------
# Kernel 1: the ENTIRE forward pass, fully fused, one lane-dense output slab
# ----------------------------------------------------------------------------
def _make_forward_kernel(V, in_dims, n_mlp, pd, cd, md, cvd, fdim, n_dec_mid, offs):
    sum_in = sum(in_dims)

    def kernel(*refs):
        out_ref = refs[-1]
        idx = 0
        xs = [refs[idx + v][...] for v in range(V)]
        idx += V

        # --- per-view encoder MLPs, views batched via packed weights ---
        acc = _dot(xs[0], refs[idx][...]); idx += 1
        for v in range(1, V):
            acc = acc + _dot(xs[v], refs[idx][...]); idx += 1
        h = _gelu(acc + refs[idx][...]); idx += 1
        for _ in range(n_mlp - 1):
            h = _gelu(_dot(h, refs[idx][...]) + refs[idx + 1][...]); idx += 2

        # --- peculiar + common heads (one packed matmul, split by lane slices) ---
        head = _gelu(_dot(h, refs[idx][...]) + refs[idx + 1][...]); idx += 2
        pec_all = head[:, :V * pd]
        com_all = head[:, V * pd:]                 # == concat(common, dim=1)

        # --- mu (== logvar) head ---
        mu_all = _gelu(_dot(pec_all, refs[idx][...]) + refs[idx + 1][...]); idx += 2

        # --- fusion network ---
        hf = _gelu(_dot(com_all, refs[idx][...]) + refs[idx + 1][...]); idx += 2
        fus = _gelu(_dot(hf, refs[idx][...]) + refs[idx + 1][...]); idx += 2

        # --- fusion_to_cluster (adjacent linears pre-merged at init) ---
        c1 = jnp.maximum(_dot(fus, refs[idx][...]) + refs[idx + 1][...], 0.0); idx += 2
        cluster = _dot(c1, refs[idx][...]) + refs[idx + 1][...]; idx += 2

        # --- cluster_to_classification (final N=1 layer as VPU dot) ---
        pcls = _gelu(_dot(cluster, refs[idx][...]) + refs[idx + 1][...]); idx += 2
        logit = jnp.sum(pcls * refs[idx][...], axis=1, keepdims=True) + refs[idx + 1][...]
        idx += 2
        pred = jax.nn.sigmoid(logit)

        # --- fresh nn.BatchNorm1d (training-mode batch stats, gamma=1, beta=0) ---
        # per-column stats on the packed mu == per-view BatchNorm
        mean = jnp.mean(mu_all, axis=0, keepdims=True)
        ctr = mu_all - mean
        var = jnp.mean(ctr * ctr, axis=0, keepdims=True)
        mu_bn = ctr * jax.lax.rsqrt(var + 1e-5)

        # TODO(synk): training-mode reparameterization would add exp(0.5*logvar)*N(0,1)
        # noise; eval-mode (z = mu) is implemented here.
        z = mu_bn

        # --- per-view decoders, views batched via packed weights ---
        hd = _gelu(_dot(z, refs[idx][...]) + _dot(cluster, refs[idx + 1][...])
                   + refs[idx + 2][...])
        idx += 3
        for _ in range(n_dec_mid):
            hd = _gelu(_dot(hd, refs[idx][...]) + refs[idx + 1][...]); idx += 2
        rec = jax.nn.sigmoid(_dot(hd, refs[idx][...]) + refs[idx + 1][...]); idx += 2

        # --- single lane-dense output slab (static lane sub-ranges) ---
        out_ref[:, offs['rec']:offs['rec'] + sum_in] = rec
        out_ref[:, offs['pec']:offs['pec'] + V * pd] = pec_all
        out_ref[:, offs['com']:offs['com'] + V * cd] = com_all
        out_ref[:, offs['fus']:offs['fus'] + fdim] = fus
        out_ref[:, offs['clu']:offs['clu'] + cvd] = cluster
        out_ref[:, offs['mu']:offs['mu'] + V * md] = mu_bn
        out_ref[:, offs['pred']:offs['pred'] + 1] = pred

    return kernel


def dilcr_forward(X_list, params):
    """JAX/Pallas equivalent of DILCR.forward (eval-mode reparameterization).
    ONE fused pallas_call for the whole forward."""
    cfg = params['cfg']
    pk = params['packed']
    V = len(X_list)
    assert V == len(cfg['in_dims'])
    X_list = [x.astype(jnp.float32) for x in X_list]
    B = X_list[0].shape[0]
    in_dims = cfg['in_dims']
    pd, cd = cfg['peculiar_dim'], cfg['common_dim']
    md, cvd = cfg['mu_logvar_dim'], cfg['cluster_var_dim']
    fdim = 3 * cd
    offs, tot = cfg['offsets'], cfg['slab_width']
    n_mlp = len(cfg['encoder_dim']) + 1
    n_dec_mid = len(cfg['encoder_dim']) - 1

    ops = list(X_list) + list(pk['enc_l0_w']) + [pk['enc_l0_b']]
    for (w, b) in pk['enc_mlp']:
        ops += [w, b]
    ops += [pk['head_w'], pk['head_b'], pk['mu_w'], pk['mu_b']]
    (wf0, bf0), (wf1, bf1) = pk['fus']
    ops += [wf0, bf0, wf1, bf1]
    ops += [pk['clu01_w'], pk['clu01_b'], pk['clu23_w'], pk['clu23_b']]
    ops += [pk['cls0_w'], pk['cls0_b'], pk['cls1_wt'], pk['cls1_b']]
    ops += [pk['dec0_wz'], pk['dec0_wc'], pk['dec0_b']]
    for (w, b) in pk['dec_mid']:
        ops += [w, b]
    ops += [pk['dec_out_w'], pk['dec_out_b']]

    slab = pl.pallas_call(
        _make_forward_kernel(V, in_dims, n_mlp, pd, cd, md, cvd, fdim, n_dec_mid, offs),
        out_shape=jax.ShapeDtypeStruct((B, tot), jnp.float32),
        in_specs=_vmem_specs(len(ops)),
        out_specs=pl.BlockSpec(memory_space=pltpu.MemorySpace.VMEM),
    )(*ops)

    # Host-side views are lazy static lane slices of the slab (only materialized
    # if actually consumed; the loss kernel consumes the slab directly).
    in_off = np.concatenate([[0], np.cumsum(in_dims)]).astype(int).tolist()
    out_list = [slab[:, offs['rec'] + in_off[v]: offs['rec'] + in_off[v + 1]]
                for v in range(V)]
    pec_list = [slab[:, offs['pec'] + v * pd: offs['pec'] + (v + 1) * pd] for v in range(V)]
    com_list = [slab[:, offs['com'] + v * cd: offs['com'] + (v + 1) * cd] for v in range(V)]
    mu_bn_list = [slab[:, offs['mu'] + v * md: offs['mu'] + (v + 1) * md] for v in range(V)]
    fusion = slab[:, offs['fus']: offs['fus'] + fdim]
    cluster_var = slab[:, offs['clu']: offs['clu'] + cvd]
    pred_output = slab[:, offs['pred']: offs['pred'] + 1]

    latent_dist = {
        'mu_logvar': [mu_bn_list, list(mu_bn_list)],   # logvar head == mu head in DILCR
        'fusion': fusion,
        'Mv_common_peculiar': [[pec_list[v], com_list[v]] for v in range(V)],
        'z': list(mu_bn_list),
        'cluster_var': cluster_var,
        '_packed': {'slab': slab, 'offsets': offs, 'in_dims': in_dims,
                    'pd': pd, 'cd': cd, 'md': md},
    }
    return out_list, latent_dist, pred_output, X_list[-1]


# ----------------------------------------------------------------------------
# Kernel 2: the full DILCR training loss (total computed in-kernel)
# ----------------------------------------------------------------------------
def _make_loss_kernel(V, B, in_dims, offs, pd, cd, md):
    assert V >= 2, "contrastive loss requires at least 2 views"
    inv_V = 1.0 / V
    cnt_pos = V * (V - 1) // 2
    cnt_neg = V * V
    inv_pos = 1.0 / (cnt_pos * TEMPERATURE)
    inv_neg = 1.0 / (cnt_neg * TEMPERATURE)
    inv_B = 1.0 / B

    def kernel(*refs):
        # refs: data_0..data_{V-1}, slab, labels, lmda(SMEM), out(SMEM)
        slab_ref = refs[V]
        lab_ref = refs[V + 1]
        lmda_ref = refs[V + 2]
        out_ref = refs[V + 3]
        slab = slab_ref[...]

        # reconstruction (whole-tensor per view, layout-agnostic (B, D))
        rec = 0.0
        off = offs['rec']
        for v in range(V):
            d = refs[v][...]
            o = slab[:, off:off + in_dims[v]]
            diff = d - o
            rec = rec + jnp.sum(diff * diff)
            off += in_dims[v]
        rec = rec * inv_V

        # KLD (logvar is aliased to mu in DILCR -- same head output)
        mu = slab[:, offs['mu']:offs['mu'] + V * md]
        lv = mu
        kld = 0.5 * jnp.sum(jnp.exp(lv) + mu * mu - 1.0 - lv) * inv_V

        # contrastive loss (VPU only -- no MXU for these tiny operands)
        def _norm(x):
            ss = jnp.sum(x * x, axis=1, keepdims=True)
            return x * jax.lax.rsqrt(jnp.maximum(ss, 1e-24))   # == x / max(|x|, 1e-12)

        cns = [_norm(slab[:, offs['com'] + v * cd: offs['com'] + (v + 1) * cd])
               for v in range(V)]
        pns = [_norm(slab[:, offs['pec'] + v * pd: offs['pec'] + (v + 1) * pd])
               for v in range(V)]
        csum = cns[0]
        for v in range(1, V):
            csum = csum + cns[v]
        psum = pns[0]
        for v in range(1, V):
            psum = psum + pns[v]
        c_sq = jnp.sum(cns[0] * cns[0], axis=1, keepdims=True)
        for v in range(1, V):
            c_sq = c_sq + jnp.sum(cns[v] * cns[v], axis=1, keepdims=True)
        # sum_{i<j} <c_i,c_j> = 0.5 * (|sum_i c_i|^2 - sum_i |c_i|^2)
        pos_row = 0.5 * (jnp.sum(csum * csum, axis=1, keepdims=True) - c_sq)
        # sum_{i,j} <c_i,p_j> = <sum_i c_i, sum_j p_j>
        neg_row = jnp.sum(csum * psum, axis=1, keepdims=True)
        pos_s = jnp.sum(jnp.exp(pos_row * inv_pos)) * inv_B
        neg_s = jnp.sum(jnp.exp(neg_row * inv_neg)) * inv_B
        i_loss = -jnp.log(pos_s / (pos_s + neg_s))

        # BCE (mean reduction, torch-style log clamp at -100)
        p = slab[:, offs['pred']:offs['pred'] + 1]
        y = lab_ref[...]
        logp = jnp.maximum(jnp.log(p), -100.0)
        log1mp = jnp.maximum(jnp.log(1.0 - p), -100.0)
        c_loss = -jnp.sum(y * logp + (1.0 - y) * log1mp) * inv_B

        out_ref[0] = rec
        out_ref[1] = kld
        out_ref[2] = i_loss
        out_ref[3] = c_loss
        out_ref[4] = (lmda_ref[0] * rec + lmda_ref[1] * kld +
                      lmda_ref[2] * i_loss + lmda_ref[3] * c_loss)
        out_ref[5] = 0.0
        out_ref[6] = 0.0
        out_ref[7] = 0.0

    return kernel


def loss_funcation_forward(view_num, data_batch, out_list, latent_dist,
                           lmda_list, batch_size, pred_output, output):
    """JAX/Pallas equivalent of loss_funcation.forward (DILCR training loss).
    Consumes the packed output slab produced by dilcr_forward; `out_list` and
    `pred_output` are accepted for API compatibility (their values already live
    inside latent_dist['_packed']['slab'])."""
    V = int(view_num)
    B = int(batch_size)
    assert V >= 2, "DILCR contrastive loss requires view_num >= 2"
    assert len(data_batch) == V
    for v in range(V):
        assert data_batch[v].shape[0] == B, "data_batch views must be (B, D) sample-major"

    packed = latent_dist['_packed']
    slab = packed['slab']
    offs, in_dims = packed['offsets'], packed['in_dims']
    pd, cd, md = packed['pd'], packed['cd'], packed['md']

    data = [d.astype(jnp.float32) for d in data_batch]
    labels = output.astype(jnp.float32)
    lmda = jnp.array([lmda_list['rec_lmda'], lmda_list['KLD_lmda'],
                      lmda_list['I_loss_lmda'], 10.0], jnp.float32)

    losses = pl.pallas_call(
        _make_loss_kernel(V, B, in_dims, offs, pd, cd, md),
        out_shape=jax.ShapeDtypeStruct((8,), jnp.float32),
        in_specs=_vmem_specs(V + 2) +
                 [pl.BlockSpec(memory_space=pltpu.MemorySpace.SMEM)],
        out_specs=pl.BlockSpec(memory_space=pltpu.MemorySpace.SMEM),
    )(*data, slab, labels, lmda)

    rec, kld, i_loss, c_loss, loss = (losses[0], losses[1], losses[2],
                                      losses[3], losses[4])
    loss_dict = {'rec_loss': rec, 'KLD': kld, 'I_loss': i_loss,
                 'C_loss': c_loss, 'loss': loss}
    return loss, loss_dict


# ----------------------------------------------------------------------------
# Pure-JAX references (sanity checks)
# ----------------------------------------------------------------------------
def _ref_lin(x, wb):
    return jnp.dot(x, wb[0], precision='highest') + wb[1]


def _dilcr_forward_ref(X_list, params):
    V = len(X_list)
    pecs, mus_raw, coms = [], [], []
    for v in range(V):
        p = params['enc'][v]
        h = X_list[v]
        for wb in p['mlp']:
            h = _gelu(_ref_lin(h, wb))
        pec = _gelu(_ref_lin(h, p['pec']))
        mu = _gelu(_ref_lin(pec, p['mu']))
        com = _gelu(_ref_lin(h, p['com']))
        pecs.append(pec); mus_raw.append(mu); coms.append(com)
    mv = jnp.concatenate(coms, axis=1)
    f = _gelu(_ref_lin(mv, params['fus'][0]))
    f = _gelu(_ref_lin(f, params['fus'][1]))
    c = _ref_lin(f, params['clu'][0])
    c = _ref_lin(c, params['clu'][1])
    c = jnp.maximum(c, 0.0)
    c = _ref_lin(c, params['clu'][2])
    cluster = _ref_lin(c, params['clu'][3])
    pr = _gelu(_ref_lin(cluster, params['cls'][0]))
    pred = jax.nn.sigmoid(_ref_lin(pr, params['cls'][1]))
    out_list, mu_bn_list = [], []
    for v in range(V):
        mu = mus_raw[v]
        mean = jnp.mean(mu, axis=0, keepdims=True)
        var = jnp.mean((mu - mean) ** 2, axis=0, keepdims=True)
        mu_bn = (mu - mean) * jax.lax.rsqrt(var + 1e-5)
        mu_bn_list.append(mu_bn)
        d = params['dec'][v]
        pac = jnp.concatenate([mu_bn, cluster], axis=1)
        h = _gelu(_ref_lin(pac, d['l0']))
        for wb in d['mid']:
            h = _gelu(_ref_lin(h, wb))
        out_list.append(jax.nn.sigmoid(_ref_lin(h, d['out'])))
    latent = {'mu_logvar': [mu_bn_list, list(mu_bn_list)], 'fusion': f,
              'Mv_common_peculiar': [[pecs[v], coms[v]] for v in range(V)],
              'z': list(mu_bn_list), 'cluster_var': cluster}
    return out_list, latent, pred, X_list[-1]


def _loss_reference(view_num, data_batch, out_list, latent_dist, lmda_list,
                    batch_size, pred, label):
    V, B = view_num, batch_size
    rec = sum(jnp.sum((data_batch[v] - out_list[v]) ** 2) for v in range(V)) / V
    mu, logvar = latent_dist['mu_logvar']
    kld = sum(0.5 * jnp.sum(jnp.exp(logvar[v]) + mu[v] ** 2 - 1.0 - logvar[v])
              for v in range(V)) / V

    def norm(x):
        return x / jnp.maximum(jnp.linalg.norm(x, axis=1, keepdims=True), 1e-12)

    mvcp = latent_dist['Mv_common_peculiar']
    pos, cnt = 0.0, 0
    for i in range(V):
        ci = norm(mvcp[i][0])
        for j in range(i + 1, V):
            pos = pos + jnp.sum(ci * norm(mvcp[j][0]), axis=1)
            cnt += 1
    pos_s = jnp.sum(jnp.exp(pos / (cnt * TEMPERATURE))) / B
    neg, cnt = 0.0, 0
    for i in range(V):
        ci = norm(mvcp[i][0])
        for j in range(V):
            neg = neg + jnp.sum(ci * norm(mvcp[j][1]), axis=1)
            cnt += 1
    neg_s = jnp.sum(jnp.exp(neg / (cnt * TEMPERATURE))) / B
    i_loss = -jnp.log(pos_s / (pos_s + neg_s))
    logp = jnp.maximum(jnp.log(pred), -100.0)
    log1mp = jnp.maximum(jnp.log(1.0 - pred), -100.0)
    c_loss = -jnp.mean(label * logp + (1 - label) * log1mp)
    return (lmda_list['rec_lmda'] * rec + lmda_list['KLD_lmda'] * kld +
            lmda_list['I_loss_lmda'] * i_loss + 10.0 * c_loss)


# ----------------------------------------------------------------------------
if __name__ == "__main__":
    key = jax.random.PRNGKey(0)
    V, B = 3, 8
    in_dims = [16, 16, 16]
    encoder_dim = [32, 32]
    feature_dim = peculiar_dim = common_dim = 32
    mu_logvar_dim, cluster_var_dim, up_and_down_dim = 8, 16, 32

    kx, kp, kl = jax.random.split(key, 3)
    X_list = [jax.random.normal(jax.random.fold_in(kx, v), (B, in_dims[v]), jnp.float32)
              for v in range(V)]
    params = init_dilcr_params(kp, in_dims, encoder_dim, feature_dim, peculiar_dim,
                               common_dim, mu_logvar_dim, cluster_var_dim,
                               up_and_down_dim)

    # ---- forward pass (single fused Pallas kernel) vs pure-JAX reference ----
    out_list, latent_dist, pred_output, X_view = dilcr_forward(X_list, params)
    jax.block_until_ready(latent_dist['_packed']['slab'])
    out_ref, latent_ref, pred_ref, _ = _dilcr_forward_ref(X_list, params)

    for v in range(V):
        np.testing.assert_allclose(np.asarray(out_list[v]), np.asarray(out_ref[v]),
                                   rtol=5e-2, atol=5e-2)
        np.testing.assert_allclose(np.asarray(latent_dist['Mv_common_peculiar'][v][0]),
                                   np.asarray(latent_ref['Mv_common_peculiar'][v][0]),
                                   rtol=5e-2, atol=5e-2)
        np.testing.assert_allclose(np.asarray(latent_dist['Mv_common_peculiar'][v][1]),
                                   np.asarray(latent_ref['Mv_common_peculiar'][v][1]),
                                   rtol=5e-2, atol=5e-2)
        np.testing.assert_allclose(np.asarray(latent_dist['mu_logvar'][0][v]),
                                   np.asarray(latent_ref['mu_logvar'][0][v]),
                                   rtol=5e-2, atol=1e-1)
    np.testing.assert_allclose(np.asarray(pred_output), np.asarray(pred_ref),
                               rtol=5e-2, atol=5e-2)
    np.testing.assert_allclose(np.asarray(latent_dist['cluster_var']),
                               np.asarray(latent_ref['cluster_var']),
                               rtol=5e-2, atol=5e-2)
    np.testing.assert_allclose(np.asarray(latent_dist['fusion']),
                               np.asarray(latent_ref['fusion']),
                               rtol=5e-2, atol=5e-2)

    # ---- training loss (single fused Pallas kernel) vs pure-JAX reference ----
    labels = (jax.random.uniform(kl, (B, 1)) > 0.5).astype(jnp.float32)
    lmda_list = {'rec_lmda': 1.0, 'KLD_lmda': 0.5, 'I_loss_lmda': 0.1}
    loss, loss_dict = loss_funcation_forward(V, X_list, out_list, latent_dist,
                                             lmda_list, B, pred_output, labels)
    jax.block_until_ready(loss)
    ref_loss = _loss_reference(V, X_list, out_list, latent_dist, lmda_list, B,
                               pred_output, labels)
    np.testing.assert_allclose(np.asarray(loss), np.asarray(ref_loss),
                               rtol=1e-4, atol=1e-3)

    print("KERNEL_OK")
</pallas_src>

<mosaic_0001>
module attributes {stable_mosaic.version = 11 : i64} {
  func.func @kernel(%arg0: memref<8x16xf32, #tpu.memory_space<vmem>>, %arg1: memref<8x16xf32, #tpu.memory_space<vmem>>, %arg2: memref<8x16xf32, #tpu.memory_space<vmem>>, %arg3: memref<16x96xf32, #tpu.memory_space<vmem>>, %arg4: memref<16x96xf32, #tpu.memory_space<vmem>>, %arg5: memref<16x96xf32, #tpu.memory_space<vmem>>, %arg6: memref<1x96xf32, #tpu.memory_space<vmem>>, %arg7: memref<96x96xf32, #tpu.memory_space<vmem>>, %arg8: memref<1x96xf32, #tpu.memory_space<vmem>>, %arg9: memref<96x96xf32, #tpu.memory_space<vmem>>, %arg10: memref<1x96xf32, #tpu.memory_space<vmem>>, %arg11: memref<96x192xf32, #tpu.memory_space<vmem>>, %arg12: memref<1x192xf32, #tpu.memory_space<vmem>>, %arg13: memref<96x24xf32, #tpu.memory_space<vmem>>, %arg14: memref<1x24xf32, #tpu.memory_space<vmem>>, %arg15: memref<96x128xf32, #tpu.memory_space<vmem>>, %arg16: memref<1x128xf32, #tpu.memory_space<vmem>>, %arg17: memref<128x96xf32, #tpu.memory_space<vmem>>, %arg18: memref<1x96xf32, #tpu.memory_space<vmem>>, %arg19: memref<96x128xf32, #tpu.memory_space<vmem>>, %arg20: memref<1x128xf32, #tpu.memory_space<vmem>>, %arg21: memref<128x16xf32, #tpu.memory_space<vmem>>, %arg22: memref<1x16xf32, #tpu.memory_space<vmem>>, %arg23: memref<16x128xf32, #tpu.memory_space<vmem>>, %arg24: memref<1x128xf32, #tpu.memory_space<vmem>>, %arg25: memref<1x128xf32, #tpu.memory_space<vmem>>, %arg26: memref<1x1xf32, #tpu.memory_space<vmem>>, %arg27: memref<24x96xf32, #tpu.memory_space<vmem>>, %arg28: memref<16x96xf32, #tpu.memory_space<vmem>>, %arg29: memref<1x96xf32, #tpu.memory_space<vmem>>, %arg30: memref<96x96xf32, #tpu.memory_space<vmem>>, %arg31: memref<1x96xf32, #tpu.memory_space<vmem>>, %arg32: memref<96x48xf32, #tpu.memory_space<vmem>>, %arg33: memref<1x48xf32, #tpu.memory_space<vmem>>, %arg34: memref<8x377xf32, #tpu.memory_space<vmem>>) attributes {dimension_semantics = [], scalar_prefetch = 0 : i64, scratch_operands = 0 : i64, tpu.core_type = #tpu.core_type<tc>} {
    %c0 = arith.constant 0 : index
    %c0_0 = arith.constant 0 : index
    %0 = vector.load %arg0[%c0, %c0_0] : memref<8x16xf32, #tpu.memory_space<vmem>>, vector<8x16xf32>
    %c0_1 = arith.constant 0 : index
    %c0_2 = arith.constant 0 : index
    %1 = vector.load %arg1[%c0_1, %c0_2] : memref<8x16xf32, #tpu.memory_space<vmem>>, vector<8x16xf32>
    %c0_3 = arith.constant 0 : index
    %c0_4 = arith.constant 0 : index
    %2 = vector.load %arg2[%c0_3, %c0_4] : memref<8x16xf32, #tpu.memory_space<vmem>>, vector<8x16xf32>
    %c0_5 = arith.constant 0 : index
    %c0_6 = arith.constant 0 : index
    %3 = vector.load %arg3[%c0_5, %c0_6] : memref<16x96xf32, #tpu.memory_space<vmem>>, vector<16x96xf32>
    %cst = arith.constant dense<0.000000e+00> : vector<8x96xf32>
    %4 = tpu.matmul %0, %3, %cst {dimension_numbers = #tpu.dot_dimension_numbers<[1], [0], [0], [1], [0, 0, 1, 1], [], []>} : vector<8x16xf32>, vector<16x96xf32>, vector<8x96xf32> -> vector<8x96xf32>
    %c0_7 = arith.constant 0 : index
    %c0_8 = arith.constant 0 : index
    %5 = vector.load %arg4[%c0_7, %c0_8] : memref<16x96xf32, #tpu.memory_space<vmem>>, vector<16x96xf32>
    %cst_9 = arith.constant dense<0.000000e+00> : vector<8x96xf32>
    %6 = tpu.matmul %1, %5, %cst_9 {dimension_numbers = #tpu.dot_dimension_numbers<[1], [0], [0], [1], [0, 0, 1, 1], [], []>} : vector<8x16xf32>, vector<16x96xf32>, vector<8x96xf32> -> vector<8x96xf32>
    %7 = arith.addf %4, %6 : vector<8x96xf32>
    %c0_10 = arith.constant 0 : index
    %c0_11 = arith.constant 0 : index
    %8 = vector.load %arg5[%c0_10, %c0_11] : memref<16x96xf32, #tpu.memory_space<vmem>>, vector<16x96xf32>
    %cst_12 = arith.constant dense<0.000000e+00> : vector<8x96xf32>
    %9 = tpu.matmul %2, %8, %cst_12 {dimension_numbers = #tpu.dot_dimension_numbers<[1], [0], [0], [1], [0, 0, 1, 1], [], []>} : vector<8x16xf32>, vector<16x96xf32>, vector<8x96xf32> -> vector<8x96xf32>
    %10 = arith.addf %7, %9 : vector<8x96xf32>
    %c0_13 = arith.constant 0 : index
    %c0_14 = arith.constant 0 : index
    %11 = vector.load %arg6[%c0_13, %c0_14] : memref<1x96xf32, #tpu.memory_space<vmem>>, vector<1x96xf32>
    %12 = vector.broadcast %11 : vector<1x96xf32> to vector<8x96xf32>
    %13 = arith.addf %10, %12 : vector<8x96xf32>
    %cst_15 = arith.constant 5.000000e-01 : f32
    %14 = vector.broadcast %cst_15 : f32 to vector<8x96xf32>
    %15 = arith.mulf %14, %13 : vector<8x96xf32>
    %cst_16 = arith.constant 4.471500e-02 : f32
    %16 = vector.broadcast %cst_16 : f32 to vector<8x96xf32>
    %17 = arith.mulf %16, %13 : vector<8x96xf32>
    %18 = arith.mulf %17, %13 : vector<8x96xf32>
    %19 = arith.mulf %18, %13 : vector<8x96xf32>
    %20 = arith.addf %13, %19 : vector<8x96xf32>
    %cst_17 = arith.constant 0.797884583 : f32
    %21 = vector.broadcast %cst_17 : f32 to vector<8x96xf32>
    %22 = arith.mulf %21, %20 : vector<8x96xf32>
    %23 = math.tanh %22 : vector<8x96xf32>
    %cst_18 = arith.constant 1.000000e+00 : f32
    %24 = vector.broadcast %cst_18 : f32 to vector<8x96xf32>
    %25 = arith.addf %24, %23 : vector<8x96xf32>
    %26 = arith.mulf %15, %25 : vector<8x96xf32>
    %c0_19 = arith.constant 0 : index
    %c0_20 = arith.constant 0 : index
    %27 = vector.load %arg7[%c0_19, %c0_20] : memref<96x96xf32, #tpu.memory_space<vmem>>, vector<96x96xf32>
    %cst_21 = arith.constant dense<0.000000e+00> : vector<8x96xf32>
    %28 = tpu.matmul %26, %27, %cst_21 {dimension_numbers = #tpu.dot_dimension_numbers<[1], [0], [0], [1], [0, 0, 1, 1], [], []>} : vector<8x96xf32>, vector<96x96xf32>, vector<8x96xf32> -> vector<8x96xf32>
    %c0_22 = arith.constant 0 : index
    %c0_23 = arith.constant 0 : index
    %29 = vector.load %arg8[%c0_22, %c0_23] : memref<1x96xf32, #tpu.memory_space<vmem>>, vector<1x96xf32>
    %30 = vector.broadcast %29 : vector<1x96xf32> to vector<8x96xf32>
    %31 = arith.addf %28, %30 : vector<8x96xf32>
    %cst_24 = arith.constant 5.000000e-01 : f32
    %32 = vector.broadcast %cst_24 : f32 to vector<8x96xf32>
    %33 = arith.mulf %32, %31 : vector<8x96xf32>
    %cst_25 = arith.constant 4.471500e-02 : f32
    %34 = vector.broadcast %cst_25 : f32 to vector<8x96xf32>
    %35 = arith.mulf %34, %31 : vector<8x96xf32>
    %36 = arith.mulf %35, %31 : vector<8x96xf32>
    %37 = arith.mulf %36, %31 : vector<8x96xf32>
    %38 = arith.addf %31, %37 : vector<8x96xf32>
    %cst_26 = arith.constant 0.797884583 : f32
    %39 = vector.broadcast %cst_26 : f32 to vector<8x96xf32>
    %40 = arith.mulf %39, %38 : vector<8x96xf32>
    %41 = math.tanh %40 : vector<8x96xf32>
    %cst_27 = arith.constant 1.000000e+00 : f32
    %42 = vector.broadcast %cst_27 : f32 to vector<8x96xf32>
    %43 = arith.addf %42, %41 : vector<8x96xf32>
    %44 = arith.mulf %33, %43 : vector<8x96xf32>
    %c0_28 = arith.constant 0 : index
    %c0_29 = arith.constant 0 : index
    %45 = vector.load %arg9[%c0_28, %c0_29] : memref<96x96xf32, #tpu.memory_space<vmem>>, vector<96x96xf32>
    %cst_30 = arith.constant dense<0.000000e+00> : vector<8x96xf32>
    %46 = tpu.matmul %44, %45, %cst_30 {dimension_numbers = #tpu.dot_dimension_numbers<[1], [0], [0], [1], [0, 0, 1, 1], [], []>} : vector<8x96xf32>, vector<96x96xf32>, vector<8x96xf32> -> vector<8x96xf32>
    %c0_31 = arith.constant 0 : index
    %c0_32 = arith.constant 0 : index
    %47 = vector.load %arg10[%c0_31, %c0_32] : memref<1x96xf32, #tpu.memory_space<vmem>>, vector<1x96xf32>
    %48 = vector.broadcast %47 : vector<1x96xf32> to vector<8x96xf32>
    %49 = arith.addf %46, %48 : vector<8x96xf32>
    %cst_33 = arith.constant 5.000000e-01 : f32
    %50 = vector.broadcast %cst_33 : f32 to vector<8x96xf32>
    %51 = arith.mulf %50, %49 : vector<8x96xf32>
    %cst_34 = arith.constant 4.471500e-02 : f32
    %52 = vector.broadcast %cst_34 : f32 to vector<8x96xf32>
    %53 = arith.mulf %52, %49 : vector<8x96xf32>
    %54 = arith.mulf %53, %49 : vector<8x96xf32>
    %55 = arith.mulf %54, %49 : vector<8x96xf32>
    %56 = arith.addf %49, %55 : vector<8x96xf32>
    %cst_35 = arith.constant 0.797884583 : f32
    %57 = vector.broadcast %cst_35 : f32 to vector<8x96xf32>
    %58 = arith.mulf %57, %56 : vector<8x96xf32>
    %59 = math.tanh %58 : vector<8x96xf32>
    %cst_36 = arith.constant 1.000000e+00 : f32
    %60 = vector.broadcast %cst_36 : f32 to vector<8x96xf32>
    %61 = arith.addf %60, %59 : vector<8x96xf32>
    %62 = arith.mulf %51, %61 : vector<8x96xf32>
    %c0_37 = arith.constant 0 : index
    %c0_38 = arith.constant 0 : index
    %63 = vector.load %arg11[%c0_37, %c0_38] : memref<96x192xf32, #tpu.memory_space<vmem>>, vector<96x192xf32>
    %cst_39 = arith.constant dense<0.000000e+00> : vector<8x192xf32>
    %64 = tpu.matmul %62, %63, %cst_39 {dimension_numbers = #tpu.dot_dimension_numbers<[1], [0], [0], [1], [0, 0, 1, 1], [], []>} : vector<8x96xf32>, vector<96x192xf32>, vector<8x192xf32> -> vector<8x192xf32>
    %c0_40 = arith.constant 0 : index
    %c0_41 = arith.constant 0 : index
    %65 = vector.load %arg12[%c0_40, %c0_41] : memref<1x192xf32, #tpu.memory_space<vmem>>, vector<1x192xf32>
    %66 = vector.broadcast %65 : vector<1x192xf32> to vector<8x192xf32>
    %67 = arith.addf %64, %66 : vector<8x192xf32>
    %cst_42 = arith.constant 5.000000e-01 : f32
    %68 = vector.broadcast %cst_42 : f32 to vector<8x192xf32>
    %69 = arith.mulf %68, %67 : vector<8x192xf32>
    %cst_43 = arith.constant 4.471500e-02 : f32
    %70 = vector.broadcast %cst_43 : f32 to vector<8x192xf32>
    %71 = arith.mulf %70, %67 : vector<8x192xf32>
    %72 = arith.mulf %71, %67 : vector<8x192xf32>
    %73 = arith.mulf %72, %67 : vector<8x192xf32>
    %74 = arith.addf %67, %73 : vector<8x192xf32>
    %cst_44 = arith.constant 0.797884583 : f32
    %75 = vector.broadcast %cst_44 : f32 to vector<8x192xf32>
    %76 = arith.mulf %75, %74 : vector<8x192xf32>
    %77 = math.tanh %76 : vector<8x192xf32>
    %cst_45 = arith.constant 1.000000e+00 : f32
    %78 = vector.broadcast %cst_45 : f32 to vector<8x192xf32>
    %79 = arith.addf %78, %77 : vector<8x192xf32>
    %80 = arith.mulf %69, %79 : vector<8x192xf32>
    %81 = vector.extract_strided_slice %80 {offsets = [0, 0], sizes = [8, 96], strides = [1, 1]} : vector<8x192xf32> to vector<8x96xf32>
    %82 = vector.extract_strided_slice %80 {offsets = [0, 96], sizes = [8, 96], strides = [1, 1]} : vector<8x192xf32> to vector<8x96xf32>
    %c0_46 = arith.constant 0 : index
    %c0_47 = arith.constant 0 : index
    %83 = vector.load %arg13[%c0_46, %c0_47] : memref<96x24xf32, #tpu.memory_space<vmem>>, vector<96x24xf32>
    %cst_48 = arith.constant dense<0.000000e+00> : vector<8x24xf32>
    %84 = tpu.matmul %81, %83, %cst_48 {dimension_numbers = #tpu.dot_dimension_numbers<[1], [0], [0], [1], [0, 0, 1, 1], [], []>} : vector<8x96xf32>, vector<96x24xf32>, vector<8x24xf32> -> vector<8x24xf32>
    %c0_49 = arith.constant 0 : index
    %c0_50 = arith.constant 0 : index
    %85 = vector.load %arg14[%c0_49, %c0_50] : memref<1x24xf32, #tpu.memory_space<vmem>>, vector<1x24xf32>
    %86 = vector.broadcast %85 : vector<1x24xf32> to vector<8x24xf32>
    %87 = arith.addf %84, %86 : vector<8x24xf32>
    %cst_51 = arith.constant 5.000000e-01 : f32
    %88 = vector.broadcast %cst_51 : f32 to vector<8x24xf32>
    %89 = arith.mulf %88, %87 : vector<8x24xf32>
    %cst_52 = arith.constant 4.471500e-02 : f32
    %90 = vector.broadcast %cst_52 : f32 to vector<8x24xf32>
    %91 = arith.mulf %90, %87 : vector<8x24xf32>
    %92 = arith.mulf %91, %87 : vector<8x24xf32>
    %93 = arith.mulf %92, %87 : vector<8x24xf32>
    %94 = arith.addf %87, %93 : vector<8x24xf32>
    %cst_53 = arith.constant 0.797884583 : f32
    %95 = vector.broadcast %cst_53 : f32 to vector<8x24xf32>
    %96 = arith.mulf %95, %94 : vector<8x24xf32>
    %97 = math.tanh %96 : vector<8x24xf32>
    %cst_54 = arith.constant 1.000000e+00 : f32
    %98 = vector.broadcast %cst_54 : f32 to vector<8x24xf32>
    %99 = arith.addf %98, %97 : vector<8x24xf32>
    %100 = arith.mulf %89, %99 : vector<8x24xf32>
    %c0_55 = arith.constant 0 : index
    %c0_56 = arith.constant 0 : index
    %101 = vector.load %arg15[%c0_55, %c0_56] : memref<96x128xf32, #tpu.memory_space<vmem>>, vector<96x128xf32>
    %cst_57 = arith.constant dense<0.000000e+00> : vector<8x128xf32>
    %102 = tpu.matmul %82, %101, %cst_57 {dimension_numbers = #tpu.dot_dimension_numbers<[1], [0], [0], [1], [0, 0, 1, 1], [], []>} : vector<8x96xf32>, vector<96x128xf32>, vector<8x128xf32> -> vector<8x128xf32>
    %c0_58 = arith.constant 0 : index
    %c0_59 = arith.constant 0 : index
    %103 = vector.load %arg16[%c0_58, %c0_59] : memref<1x128xf32, #tpu.memory_space<vmem>>, vector<1x128xf32>
    %104 = vector.broadcast %103 : vector<1x128xf32> to vector<8x128xf32>
    %105 = arith.addf %102, %104 : vector<8x128xf32>
    %cst_60 = arith.constant 5.000000e-01 : f32
    %106 = vector.broadcast %cst_60 : f32 to vector<8x128xf32>
    %107 = arith.mulf %106, %105 : vector<8x128xf32>
    %cst_61 = arith.constant 4.471500e-02 : f32
    %108 = vector.broadcast %cst_61 : f32 to vector<8x128xf32>
    %109 = arith.mulf %108, %105 : vector<8x128xf32>
    %110 = arith.mulf %109, %105 : vector<8x128xf32>
    %111 = arith.mulf %110, %105 : vector<8x128xf32>
    %112 = arith.addf %105, %111 : vector<8x128xf32>
    %cst_62 = arith.constant 0.797884583 : f32
    %113 = vector.broadcast %cst_62 : f32 to vector<8x128xf32>
    %114 = arith.mulf %113, %112 : vector<8x128xf32>
    %115 = math.tanh %114 : vector<8x128xf32>
    %cst_63 = arith.constant 1.000000e+00 : f32
    %116 = vector.broadcast %cst_63 : f32 to vector<8x128xf32>
    %117 = arith.addf %116, %115 : vector<8x128xf32>
    %118 = arith.mulf %107, %117 : vector<8x128xf32>
    %c0_64 = arith.constant 0 : index
    %c0_65 = arith.constant 0 : index
    %119 = vector.load %arg17[%c0_64, %c0_65] : memref<128x96xf32, #tpu.memory_space<vmem>>, vector<128x96xf32>
    %cst_66 = arith.constant dense<0.000000e+00> : vector<8x96xf32>
    %120 = tpu.matmul %118, %119, %cst_66 {dimension_numbers = #tpu.dot_dimension_numbers<[1], [0], [0], [1], [0, 0, 1, 1], [], []>} : vector<8x128xf32>, vector<128x96xf32>, vector<8x96xf32> -> vector<8x96xf32>
    %c0_67 = arith.constant 0 : index
    %c0_68 = arith.constant 0 : index
    %121 = vector.load %arg18[%c0_67, %c0_68] : memref<1x96xf32, #tpu.memory_space<vmem>>, vector<1x96xf32>
    %122 = vector.broadcast %121 : vector<1x96xf32> to vector<8x96xf32>
    %123 = arith.addf %120, %122 : vector<8x96xf32>
    %cst_69 = arith.constant 5.000000e-01 : f32
    %124 = vector.broadcast %cst_69 : f32 to vector<8x96xf32>
    %125 = arith.mulf %124, %123 : vector<8x96xf32>
    %cst_70 = arith.constant 4.471500e-02 : f32
    %126 = vector.broadcast %cst_70 : f32 to vector<8x96xf32>
    %127 = arith.mulf %126, %123 : vector<8x96xf32>
    %128 = arith.mulf %127, %123 : vector<8x96xf32>
    %129 = arith.mulf %128, %123 : vector<8x96xf32>
    %130 = arith.addf %123, %129 : vector<8x96xf32>
    %cst_71 = arith.constant 0.797884583 : f32
    %131 = vector.broadcast %cst_71 : f32 to vector<8x96xf32>
    %132 = arith.mulf %131, %130 : vector<8x96xf32>
    %133 = math.tanh %132 : vector<8x96xf32>
    %cst_72 = arith.constant 1.000000e+00 : f32
    %134 = vector.broadcast %cst_72 : f32 to vector<8x96xf32>
    %135 = arith.addf %134, %133 : vector<8x96xf32>
    %136 = arith.mulf %125, %135 : vector<8x96xf32>
    %c0_73 = arith.constant 0 : index
    %c0_74 = arith.constant 0 : index
    %137 = vector.load %arg19[%c0_73, %c0_74] : memref<96x128xf32, #tpu.memory_space<vmem>>, vector<96x128xf32>
    %cst_75 = arith.constant dense<0.000000e+00> : vector<8x128xf32>
    %138 = tpu.matmul %136, %137, %cst_75 {dimension_numbers = #tpu.dot_dimension_numbers<[1], [0], [0], [1], [0, 0, 1, 1], [], []>} : vector<8x96xf32>, vector<96x128xf32>, vector<8x128xf32> -> vector<8x128xf32>
    %c0_76 = arith.constant 0 : index
    %c0_77 = arith.constant 0 : index
    %139 = vector.load %arg20[%c0_76, %c0_77] : memref<1x128xf32, #tpu.memory_space<vmem>>, vector<1x128xf32>
    %140 = vector.broadcast %139 : vector<1x128xf32> to vector<8x128xf32>
    %141 = arith.addf %138, %140 : vector<8x128xf32>
    %cst_78 = arith.constant 0.000000e+00 : f32
    %142 = vector.broadcast %cst_78 : f32 to vector<8x128xf32>
    %143 = arith.maximumf %141, %142 : vector<8x128xf32>
    %c0_79 = arith.constant 0 : index
    %c0_80 = arith.constant 0 : index
    %144 = vector.load %arg21[%c0_79, %c0_80] : memref<128x16xf32, #tpu.memory_space<vmem>>, vector<128x16xf32>
    %cst_81 = arith.constant dense<0.000000e+00> : vector<8x16xf32>
    %145 = tpu.matmul %143, %144, %cst_81 {dimension_numbers = #tpu.dot_dimension_numbers<[1], [0], [0], [1], [0, 0, 1, 1], [], []>} : vector<8x128xf32>, vector<128x16xf32>, vector<8x16xf32> -> vector<8x16xf32>
    %c0_82 = arith.constant 0 : index
    %c0_83 = arith.constant 0 : index
    %146 = vector.load %arg22[%c0_82, %c0_83] : memref<1x16xf32, #tpu.memory_space<vmem>>, vector<1x16xf32>
    %147 = vector.broadcast %146 : vector<1x16xf32> to vector<8x16xf32>
    %148 = arith.addf %145, %147 : vector<8x16xf32>
    %c0_84 = arith.constant 0 : index
    %c0_85 = arith.constant 0 : index
    %149 = vector.load %arg23[%c0_84, %c0_85] : memref<16x128xf32, #tpu.memory_space<vmem>>, vector<16x128xf32>
    %cst_86 = arith.constant dense<0.000000e+00> : vector<8x128xf32>
    %150 = tpu.matmul %148, %149, %cst_86 {dimension_numbers = #tpu.dot_dimension_numbers<[1], [0], [0], [1], [0, 0, 1, 1], [], []>} : vector<8x16xf32>, vector<16x128xf32>, vector<8x128xf32> -> vector<8x128xf32>
    %c0_87 = arith.constant 0 : index
    %c0_88 = arith.constant 0 : index
    %151 = vector.load %arg24[%c0_87, %c0_88] : memref<1x128xf32, #tpu.memory_space<vmem>>, vector<1x128xf32>
    %152 = vector.broadcast %151 : vector<1x128xf32> to vector<8x128xf32>
    %153 = arith.addf %150, %152 : vector<8x128xf32>
    %cst_89 = arith.constant 5.000000e-01 : f32
    %154 = vector.broadcast %cst_89 : f32 to vector<8x128xf32>
    %155 = arith.mulf %154, %153 : vector<8x128xf32>
    %cst_90 = arith.constant 4.471500e-02 : f32
    %156 = vector.broadcast %cst_90 : f32 to vector<8x128xf32>
    %157 = arith.mulf %156, %153 : vector<8x128xf32>
    %158 = arith.mulf %157, %153 : vector<8x128xf32>
    %159 = arith.mulf %158, %153 : vector<8x128xf32>
    %160 = arith.addf %153, %159 : vector<8x128xf32>
    %cst_91 = arith.constant 0.797884583 : f32
    %161 = vector.broadcast %cst_91 : f32 to vector<8x128xf32>
    %162 = arith.mulf %161, %160 : vector<8x128xf32>
    %163 = math.tanh %162 : vector<8x128xf32>
    %cst_92 = arith.constant 1.000000e+00 : f32
    %164 = vector.broadcast %cst_92 : f32 to vector<8x128xf32>
    %165 = arith.addf %164, %163 : vector<8x128xf32>
    %166 = arith.mulf %155, %165 : vector<8x128xf32>
    %c0_93 = arith.constant 0 : index
    %c0_94 = arith.constant 0 : index
    %167 = vector.load %arg25[%c0_93, %c0_94] : memref<1x128xf32, #tpu.memory_space<vmem>>, vector<1x128xf32>
    %168 = vector.broadcast %167 : vector<1x128xf32> to vector<8x128xf32>
    %169 = arith.mulf %166, %168 : vector<8x128xf32>
    %cst_95 = arith.constant dense<0.000000e+00> : vector<8xf32>
    %170 = vector.multi_reduction <add>, %169, %cst_95 [1] : vector<8x128xf32> to vector<8xf32>
    %171 = vector.shape_cast %170 : vector<8xf32> to vector<8x1xf32>
    %c0_96 = arith.constant 0 : index
    %c0_97 = arith.constant 0 : index
    %172 = vector.load %arg26[%c0_96, %c0_97] : memref<1x1xf32, #tpu.memory_space<vmem>>, vector<1x1xf32>
    %173 = vector.broadcast %172 : vector<1x1xf32> to vector<8x1xf32>
    %174 = arith.addf %171, %173 : vector<8x1xf32>
    %175 = arith.negf %174 : vector<8x1xf32>
    %176 = math.exp %175 : vector<8x1xf32>
    %cst_98 = arith.constant 1.000000e+00 : f32
    %177 = vector.broadcast %cst_98 : f32 to vector<8x1xf32>
    %178 = arith.addf %177, %176 : vector<8x1xf32>
    %179 = arith.divf %177, %178 : vector<8x1xf32>
    %cst_99 = arith.constant dense<0.000000e+00> : vector<24xf32>
    %180 = vector.multi_reduction <add>, %100, %cst_99 [0] : vector<8x24xf32> to vector<24xf32>
    %181 = vector.shape_cast %180 : vector<24xf32> to vector<1x24xf32>
    %cst_100 = arith.constant 8.000000e+00 : f32
    %182 = vector.broadcast %cst_100 : f32 to vector<1x24xf32>
    %183 = arith.divf %181, %182 : vector<1x24xf32>
    %184 = vector.broadcast %183 : vector<1x24xf32> to vector<8x24xf32>
    %185 = arith.subf %100, %184 : vector<8x24xf32>
    %186 = arith.mulf %185, %185 : vector<8x24xf32>
    %cst_101 = arith.constant dense<0.000000e+00> : vector<24xf32>
    %187 = vector.multi_reduction <add>, %186, %cst_101 [0] : vector<8x24xf32> to vector<24xf32>
    %188 = vector.shape_cast %187 : vector<24xf32> to vector<1x24xf32>
    %cst_102 = arith.constant 8.000000e+00 : f32
    %189 = vector.broadcast %cst_102 : f32 to vector<1x24xf32>
    %190 = arith.divf %188, %189 : vector<1x24xf32>
    %cst_103 = arith.constant 9.99999974E-6 : f32
    %191 = vector.broadcast %cst_103 : f32 to vector<1x24xf32>
    %192 = arith.addf %190, %191 : vector<1x24xf32>
    %193 = math.rsqrt %192 : vector<1x24xf32>
    %194 = vector.broadcast %193 : vector<1x24xf32> to vector<8x24xf32>
    %195 = arith.mulf %185, %194 : vector<8x24xf32>
    %c0_104 = arith.constant 0 : index
    %c0_105 = arith.constant 0 : index
    %196 = vector.load %arg27[%c0_104, %c0_105] : memref<24x96xf32, #tpu.memory_space<vmem>>, vector<24x96xf32>
    %cst_106 = arith.constant dense<0.000000e+00> : vector<8x96xf32>
    %197 = tpu.matmul %195, %196, %cst_106 {dimension_numbers = #tpu.dot_dimension_numbers<[1], [0], [0], [1], [0, 0, 1, 1], [], []>} : vector<8x24xf32>, vector<24x96xf32>, vector<8x96xf32> -> vector<8x96xf32>
    %c0_107 = arith.constant 0 : index
    %c0_108 = arith.constant 0 : index
    %198 = vector.load %arg28[%c0_107, %c0_108] : memref<16x96xf32, #tpu.memory_space<vmem>>, vector<16x96xf32>
    %cst_109 = arith.constant dense<0.000000e+00> : vector<8x96xf32>
    %199 = tpu.matmul %148, %198, %cst_109 {dimension_numbers = #tpu.dot_dimension_numbers<[1], [0], [0], [1], [0, 0, 1, 1], [], []>} : vector<8x16xf32>, vector<16x96xf32>, vector<8x96xf32> -> vector<8x96xf32>
    %200 = arith.addf %197, %199 : vector<8x96xf32>
    %c0_110 = arith.constant 0 : index
    %c0_111 = arith.constant 0 : index
    %201 = vector.load %arg29[%c0_110, %c0_111] : memref<1x96xf32, #tpu.memory_space<vmem>>, vector<1x96xf32>
    %202 = vector.broadcast %201 : vector<1x96xf32> to vector<8x96xf32>
    %203 = arith.addf %200, %202 : vector<8x96xf32>
    %cst_112 = arith.constant 5.000000e-01 : f32
    %204 = vector.broadcast %cst_112 : f32 to vector<8x96xf32>
    %205 = arith.mulf %204, %203 : vector<8x96xf32>
    %cst_113 = arith.constant 4.471500e-02 : f32
    %206 = vector.broadcast %cst_113 : f32 to vector<8x96xf32>
    %207 = arith.mulf %206, %203 : vector<8x96xf32>
    %208 = arith.mulf %207, %203 : vector<8x96xf32>
    %209 = arith.mulf %208, %203 : vector<8x96xf32>
    %210 = arith.addf %203, %209 : vector<8x96xf32>
    %cst_114 = arith.constant 0.797884583 : f32
    %211 = vector.broadcast %cst_114 : f32 to vector<8x96xf32>
    %212 = arith.mulf %211, %210 : vector<8x96xf32>
    %213 = math.tanh %212 : vector<8x96xf32>
    %cst_115 = arith.constant 1.000000e+00 : f32
    %214 = vector.broadcast %cst_115 : f32 to vector<8x96xf32>
    %215 = arith.addf %214, %213 : vector<8x96xf32>
    %216 = arith.mulf %205, %215 : vector<8x96xf32>
    %c0_116 = arith.constant 0 : index
    %c0_117 = arith.constant 0 : index
    %217 = vector.load %arg30[%c0_116, %c0_117] : memref<96x96xf32, #tpu.memory_space<vmem>>, vector<96x96xf32>
    %cst_118 = arith.constant dense<0.000000e+00> : vector<8x96xf32>
    %218 = tpu.matmul %216, %217, %cst_118 {dimension_numbers = #tpu.dot_dimension_numbers<[1], [0], [0], [1], [0, 0, 1, 1], [], []>} : vector<8x96xf32>, vector<96x96xf32>, vector<8x96xf32> -> vector<8x96xf32>
    %c0_119 = arith.constant 0 : index
    %c0_120 = arith.constant 0 : index
    %219 = vector.load %arg31[%c0_119, %c0_120] : memref<1x96xf32, #tpu.memory_space<vmem>>, vector<1x96xf32>
    %220 = vector.broadcast %219 : vector<1x96xf32> to vector<8x96xf32>
    %221 = arith.addf %218, %220 : vector<8x96xf32>
    %cst_121 = arith.constant 5.000000e-01 : f32
    %222 = vector.broadcast %cst_121 : f32 to vector<8x96xf32>
    %223 = arith.mulf %222, %221 : vector<8x96xf32>
    %cst_122 = arith.constant 4.471500e-02 : f32
    %224 = vector.broadcast %cst_122 : f32 to vector<8x96xf32>
    %225 = arith.mulf %224, %221 : vector<8x96xf32>
    %226 = arith.mulf %225, %221 : vector<8x96xf32>
    %227 = arith.mulf %226, %221 : vector<8x96xf32>
    %228 = arith.addf %221, %227 : vector<8x96xf32>
    %cst_123 = arith.constant 0.797884583 : f32
    %229 = vector.broadcast %cst_123 : f32 to vector<8x96xf32>
    %230 = arith.mulf %229, %228 : vector<8x96xf32>
    %231 = math.tanh %230 : vector<8x96xf32>
    %cst_124 = arith.constant 1.000000e+00 : f32
    %232 = vector.broadcast %cst_124 : f32 to vector<8x96xf32>
    %233 = arith.addf %232, %231 : vector<8x96xf32>
    %234 = arith.mulf %223, %233 : vector<8x96xf32>
    %c0_125 = arith.constant 0 : index
    %c0_126 = arith.constant 0 : index
    %235 = vector.load %arg32[%c0_125, %c0_126] : memref<96x48xf32, #tpu.memory_space<vmem>>, vector<96x48xf32>
    %cst_127 = arith.constant dense<0.000000e+00> : vector<8x48xf32>
    %236 = tpu.matmul %234, %235, %cst_127 {dimension_numbers = #tpu.dot_dimension_numbers<[1], [0], [0], [1], [0, 0, 1, 1], [], []>} : vector<8x96xf32>, vector<96x48xf32>, vector<8x48xf32> -> vector<8x48xf32>
    %c0_128 = arith.constant 0 : index
    %c0_129 = arith.constant 0 : index
    %237 = vector.load %arg33[%c0_128, %c0_129] : memref<1x48xf32, #tpu.memory_space<vmem>>, vector<1x48xf32>
    %238 = vector.broadcast %237 : vector<1x48xf32> to vector<8x48xf32>
    %239 = arith.addf %236, %238 : vector<8x48xf32>
    %240 = arith.negf %239 : vector<8x48xf32>
    %241 = math.exp %240 : vector<8x48xf32>
    %cst_130 = arith.constant 1.000000e+00 : f32
    %242 = vector.broadcast %cst_130 : f32 to vector<8x48xf32>
    %243 = arith.addf %242, %241 : vector<8x48xf32>
    %244 = arith.divf %242, %243 : vector<8x48xf32>
    %c0_131 = arith.constant 0 : index
    %c0_132 = arith.constant 0 : index
    %245 = vector.load %arg34[%c0_131, %c0_132] : memref<8x377xf32, #tpu.memory_space<vmem>>, vector<8x48xf32>
    tpu.vector_store %arg34[%c0_131, %c0_132], %244 {strides = array<i32>} : memref<8x377xf32, #tpu.memory_space<vmem>>, vector<8x48xf32>,
    %c0_133 = arith.constant 0 : index
    %c48 = arith.constant 48 : index
    %246 = vector.load %arg34[%c0_133, %c48] : memref<8x377xf32, #tpu.memory_space<vmem>>, vector<8x96xf32>
    tpu.vector_store %arg34[%c0_133, %c48], %81 {strides = array<i32>} : memref<8x377xf32, #tpu.memory_space<vmem>>, vector<8x96xf32>,
    %c0_134 = arith.constant 0 : index
    %c144 = arith.constant 144 : index
    %247 = vector.load %arg34[%c0_134, %c144] : memref<8x377xf32, #tpu.memory_space<vmem>>, vector<8x96xf32>
    tpu.vector_store %arg34[%c0_134, %c144], %82 {strides = array<i32>} : memref<8x377xf32, #tpu.memory_space<vmem>>, vector<8x96xf32>,
    %c0_135 = arith.constant 0 : index
    %c240 = arith.constant 240 : index
    %248 = vector.load %arg34[%c0_135, %c240] : memref<8x377xf32, #tpu.memory_space<vmem>>, vector<8x96xf32>
    tpu.vector_store %arg34[%c0_135, %c240], %136 {strides = array<i32>} : memref<8x377xf32, #tpu.memory_space<vmem>>, vector<8x96xf32>,
    %c0_136 = arith.constant 0 : index
    %c336 = arith.constant 336 : index
    %249 = vector.load %arg34[%c0_136, %c336] : memref<8x377xf32, #tpu.memory_space<vmem>>, vector<8x16xf32>
    tpu.vector_store %arg34[%c0_136, %c336], %148 {strides = array<i32>} : memref<8x377xf32, #tpu.memory_space<vmem>>, vector<8x16xf32>,
    %c0_137 = arith.constant 0 : index
    %c352 = arith.constant 352 : index
    %250 = vector.load %arg34[%c0_137, %c352] : memref<8x377xf32, #tpu.memory_space<vmem>>, vector<8x24xf32>
    tpu.vector_store %arg34[%c0_137, %c352], %195 {strides = array<i32>} : memref<8x377xf32, #tpu.memory_space<vmem>>, vector<8x24xf32>,
    %c0_138 = arith.constant 0 : index
    %c376 = arith.constant 376 : index
    %251 = vector.load %arg34[%c0_138, %c376] : memref<8x377xf32, #tpu.memory_space<vmem>>, vector<8x1xf32>
    tpu.vector_store %arg34[%c0_138, %c376], %179 {strides = array<i32>} : memref<8x377xf32, #tpu.memory_space<vmem>>, vector<8x1xf32>,
    return
  }
}

</mosaic_0001>

<bundles_post_ra>
// kernel: tpu_custom_call.1
= control target key start
LH: loop header
LB: loop body
LE: loop exit
PB: predicated region body
PF: predicated region fallthrough
CT: control target
= control target key end

     0   :  { %s2091_s6 = smov 1   ;;  %s2092_s10 = smov 2   ;;  %s2605_s0 = inlined_call_operand.smem [shape: u32[35], index: -1, kind: input, shape index: {}] }
   0x1   :  { %s2166_s5 = sld [smem:[%s2605_s0]]   ;;  %s2093_s14 = smov 3  }
   0x2   :  { %s2171_s9 = sld [smem:[%s2605_s0 + %s2091_s6]]   ;;  %s2094_s18 = smov 4  }
   0x3   :  { %s2176_s13 = sld [smem:[%s2605_s0 + %s2092_s10]]   ;;  %s2095_s22 = smov 5  }
   0x4   :  { %s2181_s17 = sld [smem:[%s2605_s0 + %s2093_s14]]   ;;  %s2096_s26 = smov 6  }
   0x5   :  { %s2186_s21 = sld [smem:[%s2605_s0 + %s2094_s18]]   ;;  %s2097_s30 = smov 7  }
   0x6   :  { %s2191_s25 = sld [smem:[%s2605_s0 + %s2095_s22]]   ;;  %s2098_s4 = smov 8  }
   0x7   :  { %s2196_s29 = sld [smem:[%s2605_s0 + %s2096_s26]]   ;;  %s2099_s10 = smov 9  }
   0x8   :  { %s2201_s3 = sld [smem:[%s2605_s0 + %s2097_s30]]   ;;  %s2100_s15 = smov 10  }
   0x9   :  { %s2206_s8 = sld [smem:[%s2605_s0 + %s2098_s4]]   ;;  %s2101_s20 = smov 11  }
   0xa   :  { %2621 = sst [smem:[#allocation53_spill]] %s2181_s17  ;;  %s2102_s26 = smov 12  }
   0xb   :  { %s2211_s14 = sld [smem:[%s2605_s0 + %s2099_s10]]   ;;  %s2103_s1 = smov 13  }
   0xc   :  { %s2216_s19 = sld [smem:[%s2605_s0 + %s2100_s15]]   ;;  %s2104_s7 = smov 14  }
   0xd   :  { %s2221_s24 = sld [smem:[%s2605_s0 + %s2101_s20]]   ;;  %s2105_s15 = smov 15  }
   0xe   :  { %2622 = sst [smem:[#allocation54_spill]] %s2201_s3  ;;  %s2106_s22 = smov 16  }
   0xf   :  { %2623 = sst [smem:[#allocation55_spill]] %s2206_s8  ;;  %s2107_s28 = smov 17  }
  0x10   :  { %s2226_s30 = sld [smem:[%s2605_s0 + %s2102_s26]]   ;;  %s2117_s16 = smov 27  }
  0x11   :  { %2624 = sst [smem:[#allocation56_spill]] %s2211_s14  ;;  %s2118_s23 = smov 28  }
  0x12   :  { %s2231_s6 = sld [smem:[%s2605_s0 + %s2103_s1]]   ;;  %s2119_s1 = smov 29  }
  0x13   :  { %2625 = sst [smem:[#allocation57_spill]] %s2221_s24  ;;  %s2120_s10 = smov 30  }
  0x14   :  { %s2236_s12 = sld [smem:[%s2605_s0 + %s2104_s7]]   ;;  %s2108_s7 = smov 18  }
  0x15   :  { %s2241_s20 = sld [smem:[%s2605_s0 + %s2105_s15]]   ;;  %s2109_s15 = smov 19  }
  0x16   :  { %2626 = sst [smem:[#allocation58_spill]] %s2226_s30 }
  0x17   :  { %s2246_s27 = sld [smem:[%s2605_s0 + %s2106_s22]]   ;;  %s2110_s22 = smov 20  }
  0x18   :  { %2627 = sst [smem:[#allocation59_spill]] %s2231_s6 }
  0x19   :  { %s2251_s4 = sld [smem:[%s2605_s0 + %s2107_s28]]   ;;  %s2111_s28 = smov 21  }
  0x1a   :  { %2628 = sst [smem:[#allocation60_spill]] %s2236_s12 }
  0x1b   :  { %s2256_s30 = sld [smem:[%s2605_s0 + %s2108_s7]]   ;;  %s2112_s7 = smov 22  }
  0x1c   :  { %s2261_s6 = sld [smem:[%s2605_s0 + %s2109_s15]]   ;;  %s2113_s15 = smov 23  }
  0x1d   :  { %2629 = sst [smem:[#allocation61_spill]] %s2246_s27 }
  0x1e   :  { %s2266_s24 = sld [smem:[%s2605_s0 + %s2110_s22]]   ;;  %s2114_s22 = smov 24  }
  0x1f   :  { %2630 = sst [smem:[#allocation62_spill]] %s2251_s4 }
  0x20   :  { %s2271_s4 = sld [smem:[%s2605_s0 + %s2111_s28]]   ;;  %s2115_s28 = smov 25  }
  0x21   :  { %s2276_s14 = sld [smem:[%s2605_s0 + %s2112_s7]]   ;;  %s2116_s7 = smov 26  }
  0x22   :  { %2631 = sst [smem:[#allocation63_spill]] %s2261_s6 }
  0x23   :  { %s2281_s3 = sld [smem:[%s2605_s0 + %s2113_s15]]  }
  0x24   :  { %s2286_s17 = sld [smem:[%s2605_s0 + %s2114_s22]]  }
  0x25   :  { %s2299_s6 = sld [smem:[%s2605_s0 + %s2117_s16]]   ;;  %s2121_s16 = smov 31  }
  0x26   :  { %2632 = sst [smem:[#allocation64_spill]] %s2271_s4 }
  0x27   :  { %2633 = sst [smem:[#allocation65_spill]] %s2276_s14 }
  0x28   :  { %s2291_s4 = sld [smem:[%s2605_s0 + %s2115_s28]]  }
  0x29   :  { %s1348_s14 = sld [smem:[%s2605_s0 + %s2116_s7]]  }
  0x2a   :  { %2634 = sst [smem:[#allocation66_spill]] %s2286_s17 }
  0x2b   :  { %2635 = sst [smem:[#allocation67_spill]] %s2299_s6 }
  0x2c   :  { %s2304_s17 = sld [smem:[%s2605_s0 + %s2118_s23]]   ;;  %s2122_s23 = smov 32  }
  0x2d   :  { %s2309_s27 = sld [smem:[%s2605_s0 + %s2119_s1]]   ;;  %s2123_s1 = smov 33  }
  0x2e   :  { %s2314_s12 = sld [smem:[%s2605_s0 + %s2120_s10]]   ;;  %s2124_s10 = smov 34  }
  0x2f   :  { %s2319_s6 = sld [smem:[%s2605_s0 + %s2121_s16]]   ;;  %v74_v0 = vstv %s1348_s14 }
  0x30   :  { %s2324_s8 = sld [smem:[%s2605_s0 + %s2122_s23]]   ;;  %75 = vst [vmem:[#allocation2] sm:$0x1] %v74_v0 }
  0x31   :  { %s2329_s7 = sld [smem:[%s2605_s0 + %s2123_s1]]  }
  0x32   :  { %s2334_s16 = sld [smem:[%s2605_s0 + %s2124_s10]]  }
  0x34   :  { %2636 = sst [smem:[#allocation68_spill]] %s2314_s12 }
  0x35   :  { %76 = vsyncpa [#allocation4], 0 }
  0x36   :  { %77 = vsyncpa [#allocation7], 0 }
  0x37   :  { %78 = vsyncpa [#allocation10], 0 }
  0x38   :  { %79 = vsyncpa [#allocation13], 0 }
  0x39   :  { %80 = vsyncpa [#allocation16], 0 }
  0x3a   :  { %81 = vsyncpa [#allocation19], 0 }
  0x3b   :  { %82 = vsyncpa [#allocation22], 0 }
  0x3c   :  { %83 = vsyncpa [#allocation25], 0 }
  0x3d   :  { %84 = vsyncpa [#allocation28], 0 }
  0x3e   :  { %85 = vsyncpa [#allocation31], 0 }
  0x3f   :  { %86 = vsyncpa [#allocation34], 0 }
  0x40   :  { %87 = vsyncpa [#allocation37], 0  ;;  %s105_s14 = sshll.u32 %s2171_s9, 4  ;;  %s106_s14 = int_to_ptr.hbm [resolvable:$true] %s105_s14 }
  0x41   :  { %88 = vsyncpa [#allocation5], 0  ;;  %s2125_s0 = smov [#allocation6]   ;;  %s128_s15 = sshll.u32 %s2186_s21, 4  ;;  %s129_s15 = int_to_ptr.hbm [resolvable:$true] %s128_s15 }
  0x42   :  { %s107_s12 = sshll.u32 %s2125_s0, 4  ;;  %s1489_s18 = sshra.s32 %s106_s14, 4  ;;  %s108_s12 = int_to_ptr.vmem [resolvable:$true] %s107_s12  ;;  %s1490_s18 = int_to_ptr.hbm [resolvable:$true] %s1489_s18 }
  0x43   :  { %s1491_s23 = scalar_lea.hbm %s1490_s18, 8  ;;  %s1493_s22 = scalar_lea.hbm %s2171_s9, 8 }
  0x44   :  { %p1492_p0 = scmp.ne.s32.totalorder %s1490_s18, %s1491_s23  ;;  %p1494_p1 = scmp.lt.s32.totalorder %s1490_s18, %s2171_s9 }
  0x45   :  { %p1495_p2 = scmp.lt.s32.totalorder %s1493_s22, %s1491_s23 }
  0x47   :  { %p1496_p3 = por %p1495_p2, %p1494_p1 }
  0x49   :  { %p1497_p4 = pnand %p1496_p3, %p1492_p0 }
  0x4b   :  { %1500 = shalt.err (!%p1497_p4)
}
  0x4c   :  { %110 = dma.hbm_to_vmem [thread:$0]  %s106_s14, 128, %s108_s12, [#allocation7]  }
  0x4d   :  { %s2126_s26 = smov [#allocation9]   ;;  %s1513_s28 = sshra.s32 %s129_s15, 4  ;;  %s1514_s28 = int_to_ptr.hbm [resolvable:$true] %s1513_s28 }
  0x4e   :  { %s130_s1 = sshll.u32 %s2126_s26, 4  ;;  %s1515_s2 = scalar_lea.hbm %s1514_s28, 16  ;;  %s131_s1 = int_to_ptr.vmem [resolvable:$true] %s130_s1 }
  0x4f   :  { %p1516_p5 = scmp.ne.s32.totalorder %s1514_s28, %s1515_s2  ;;  %s1517_s10 = scalar_lea.hbm %s2186_s21, 16 }
  0x50   :  { %p1518_p6 = scmp.lt.s32.totalorder %s1514_s28, %s2186_s21  ;;  %p1519_p7 = scmp.lt.s32.totalorder %s1517_s10, %s1515_s2 }
  0x52   :  { %p1520_p8 = por %p1519_p7, %p1518_p6 }
  0x54   :  { %p1521_p9 = pnand %p1520_p8, %p1516_p5 }
  0x56   :  { %1524 = shalt.err (!%p1521_p9)
}
  0x57   :  { %s2127_s9 = smov 128   ;;  %s2128_s11 = smov 8  }
  0x58   :  { %136 = dma.hbm_to_vmem [thread:$0]  %s129_s15, 256, %s131_s1, [#allocation10], %s2127_s9, %s2127_s9, %s2128_s11  }
  0x59   :  { %s155_s14 = sshll.u32 %s2196_s29, 4  ;;  %s2129_s0 = smov [#allocation12]   ;;  %s156_s14 = int_to_ptr.hbm [resolvable:$true] %s155_s14 }
  0x5a   :  { %s157_s12 = sshll.u32 %s2129_s0, 4  ;;  %s181_s21 = sshll.u32 %s2216_s19, 4  ;;  %s158_s12 = int_to_ptr.vmem [resolvable:$true] %s157_s12  ;;  %s182_s21 = int_to_ptr.hbm [resolvable:$true] %s181_s21 }
  0x5b   :  { %s1537_s18 = sshra.s32 %s156_s14, 4  ;;  %s1541_s22 = scalar_lea.hbm %s2196_s29, 1  ;;  %s1538_s18 = int_to_ptr.hbm [resolvable:$true] %s1537_s18 }
  0x5c   :  { %s1539_s23 = scalar_lea.hbm %s1538_s18, 1  ;;  %p1542_p11 = scmp.lt.s32.totalorder %s1538_s18, %s2196_s29 }
  0x5d   :  { %p1540_p10 = scmp.ne.s32.totalorder %s1538_s18, %s1539_s23  ;;  %p1543_p12 = scmp.lt.s32.totalorder %s1541_s22, %s1539_s23 }
  0x5f   :  { %p1544_p13 = por %p1543_p12, %p1542_p11 }
  0x61   :  { %p1545_p0 = pnand %p1544_p13, %p1540_p10 }
  0x63   :  { %1548 = shalt.err (!%p1545_p0)
}
  0x64   :  { %160 = dma.hbm_to_vmem [thread:$0]  %s156_s14, 16, %s158_s12, [#allocation13]  }
  0x65   :  { %s2130_s15 = smov [#allocation15]   ;;  %s208_s1 = sshll.u32 %s2241_s20, 4  ;;  %s2350_s1 = int_to_ptr.hbm [resolvable:$true] %s208_s1 }
  0x66   :  { %s183_s26 = sshll.u32 %s2130_s15, 4  ;;  %s1561_s28 = sshra.s32 %s182_s21, 4  ;;  %s184_s26 = int_to_ptr.vmem [resolvable:$true] %s183_s26  ;;  %s1562_s28 = int_to_ptr.hbm [resolvable:$true] %s1561_s28 }
  0x67   :  { %s1563_s2 = scalar_lea.hbm %s1562_s28, 1  ;;  %s1565_s29 = scalar_lea.hbm %s2216_s19, 1 }
  0x68   :  { %p1564_p1 = scmp.ne.s32.totalorder %s1562_s28, %s1563_s2  ;;  %p1566_p2 = scmp.lt.s32.totalorder %s1562_s28, %s2216_s19 }
  0x69   :  { %p1567_p3 = scmp.lt.s32.totalorder %s1565_s29, %s1563_s2 }
  0x6b   :  { %p1568_p4 = por %p1567_p3, %p1566_p2 }
  0x6d   :  { %p1569_p5 = pnand %p1568_p4, %p1564_p1 }
  0x6f   :  { %1572 = shalt.err (!%p1569_p5)
}
  0x70   :  { %186 = dma.hbm_to_vmem [thread:$0]  %s182_s21, 16, %s184_s26, [#allocation16]  }
  0x71   :  { %s235_s10 = sshll.u32 %s2256_s30, 4  ;;  %s2131_s14 = smov [#allocation18]   ;;  %s236_s10 = int_to_ptr.hbm [resolvable:$true] %s235_s10 }
  0x72   :  { %s210_s0 = sshll.u32 %s2131_s14, 4  ;;  %s1585_s12 = sshra.s32 %s2350_s1, 4  ;;  %s211_s0 = int_to_ptr.vmem [resolvable:$true] %s210_s0  ;;  %s1586_s12 = int_to_ptr.hbm [resolvable:$true] %s1585_s12 }
  0x73   :  { %s1587_s18 = scalar_lea.hbm %s1586_s12, 96  ;;  %s1589_s23 = scalar_lea.hbm %s2241_s20, 96 }
  0x74   :  { %p1588_p6 = scmp.ne.s32.totalorder %s1586_s12, %s1587_s18  ;;  %p1590_p7 = scmp.lt.s32.totalorder %s1586_s12, %s2241_s20 }
  0x75   :  { %p1591_p8 = scmp.lt.s32.totalorder %s1589_s23, %s1587_s18 }
  0x77   :  { %p1592_p9 = por %p1591_p8, %p1590_p7 }
  0x79   :  { %p1593_p10 = pnand %p1592_p9, %p1588_p6 }
  0x7b   :  { %1596 = shalt.err (!%p1593_p10)
}
  0x7c   :  { %216 = dma.hbm_to_vmem [thread:$0]  %s2350_s1, 1536, %s211_s0, [#allocation19], %s2127_s9, %s2127_s9, %s2128_s11  }
  0x7d   :  { %s2132_s19 = smov [#allocation21]   ;;  %s259_s22 = sshll.u32 %s2266_s24, 4  ;;  %s260_s22 = int_to_ptr.hbm [resolvable:$true] %s259_s22 }
  0x7e   :  { %s237_s21 = sshll.u32 %s2132_s19, 4  ;;  %s1609_s15 = sshra.s32 %s236_s10, 4  ;;  %s238_s21 = int_to_ptr.vmem [resolvable:$true] %s237_s21  ;;  %s1610_s15 = int_to_ptr.hbm [resolvable:$true] %s1609_s15 }
  0x7f   :  { %s1611_s20 = scalar_lea.hbm %s1610_s15, 1  ;;  %s1613_s26 = scalar_lea.hbm %s2256_s30, 1 }
  0x80   :  { %p1612_p11 = scmp.ne.s32.totalorder %s1610_s15, %s1611_s20  ;;  %p1614_p12 = scmp.lt.s32.totalorder %s1610_s15, %s2256_s30 }
  0x81   :  { %p1615_p13 = scmp.lt.s32.totalorder %s1613_s26, %s1611_s20 }
  0x83   :  { %p1616_p0 = por %p1615_p13, %p1614_p12 }
  0x85   :  { %p1617_p1 = pnand %p1616_p0, %p1612_p11 }
  0x87   :  { %1620 = shalt.err (!%p1617_p1)
}
  0x88   :  { %240 = dma.hbm_to_vmem [thread:$0]  %s236_s10, 16, %s238_s21, [#allocation22]  }
  0x89   :  { %s282_s1 = sshll.u32 %s2281_s3, 4  ;;  %s2133_s28 = smov [#allocation24]   ;;  %s2366_s1 = int_to_ptr.hbm [resolvable:$true] %s282_s1 }
  0x8a   :  { %s261_s2 = sshll.u32 %s2133_s28, 4  ;;  %s1633_s29 = sshra.s32 %s260_s22, 4  ;;  %s262_s2 = int_to_ptr.vmem [resolvable:$true] %s261_s2  ;;  %s1634_s29 = int_to_ptr.hbm [resolvable:$true] %s1633_s29 }
  0x8b   :  { %s1635_s14 = scalar_lea.hbm %s1634_s29, 1  ;;  %s1637_s0 = scalar_lea.hbm %s2266_s24, 1 }
  0x8c   :  { %p1636_p2 = scmp.ne.s32.totalorder %s1634_s29, %s1635_s14  ;;  %p1638_p3 = scmp.lt.s32.totalorder %s1634_s29, %s2266_s24 }
  0x8d   :  { %p1639_p4 = scmp.lt.s32.totalorder %s1637_s0, %s1635_s14 }
  0x8f   :  { %p1640_p5 = por %p1639_p4, %p1638_p3 }
  0x91   :  { %p1641_p6 = pnand %p1640_p5, %p1636_p2 }
  0x93   :  { %1644 = shalt.err (!%p1641_p6)
}
  0x94   :  { %264 = dma.hbm_to_vmem [thread:$0]  %s260_s22, 16, %s262_s2, [#allocation25]  }
  0x95   :  { %s2134_s30 = smov [#allocation27]   ;;  %s307_s12 = sshll.u32 %s2291_s4, 4  ;;  %s308_s12 = int_to_ptr.hbm [resolvable:$true] %s307_s12 }
  0x96   :  { %s284_s10 = sshll.u32 %s2134_s30, 4  ;;  %s1657_s18 = sshra.s32 %s2366_s1, 4  ;;  %s285_s10 = int_to_ptr.vmem [resolvable:$true] %s284_s10  ;;  %s1658_s18 = int_to_ptr.hbm [resolvable:$true] %s1657_s18 }
  0x97   :  { %s1659_s23 = scalar_lea.hbm %s1658_s18, 16  ;;  %s1661_s19 = scalar_lea.hbm %s2281_s3, 16 }
  0x98   :  { %p1660_p7 = scmp.ne.s32.totalorder %s1658_s18, %s1659_s23  ;;  %p1662_p8 = scmp.lt.s32.totalorder %s1658_s18, %s2281_s3 }
  0x99   :  { %p1663_p9 = scmp.lt.s32.totalorder %s1661_s19, %s1659_s23 }
  0x9b   :  { %p1664_p10 = por %p1663_p9, %p1662_p8 }
  0x9d   :  { %p1665_p11 = pnand %p1664_p10, %p1660_p7 }
  0x9f   :  { %1668 = shalt.err (!%p1665_p11)
}
  0xa0   :  { %290 = dma.hbm_to_vmem [thread:$0]  %s2366_s1, 256, %s285_s10, [#allocation28], %s2127_s9, %s2127_s9, %s2128_s11  }
  0xa1   :  { %s332_s24 = sshll.u32 %s2304_s17, 4  ;;  %s2135_s21 = smov [#allocation30]   ;;  %s2379_s24 = int_to_ptr.hbm [resolvable:$true] %s332_s24 }
  0xa2   :  { %s309_s22 = sshll.u32 %s2135_s21, 4  ;;  %s1681_s15 = sshra.s32 %s308_s12, 4  ;;  %s310_s22 = int_to_ptr.vmem [resolvable:$true] %s309_s22  ;;  %s1682_s15 = int_to_ptr.hbm [resolvable:$true] %s1681_s15 }
  0xa3   :  { %s1683_s3 = scalar_lea.hbm %s1682_s15, 1  ;;  %s1685_s20 = scalar_lea.hbm %s2291_s4, 1 }
  0xa4   :  { %p1684_p12 = scmp.ne.s32.totalorder %s1682_s15, %s1683_s3  ;;  %p1686_p13 = scmp.lt.s32.totalorder %s1682_s15, %s2291_s4 }
  0xa5   :  { %p1687_p0 = scmp.lt.s32.totalorder %s1685_s20, %s1683_s3 }
  0xa7   :  { %p1688_p1 = por %p1687_p0, %p1686_p13 }
  0xa9   :  { %p1689_p2 = pnand %p1688_p1, %p1684_p12 }
  0xab   :  { %1692 = shalt.err (!%p1689_p2)
}
  0xac   :  { %312 = dma.hbm_to_vmem [thread:$0]  %s308_s12, 16, %s310_s22, [#allocation31]  }
  0xad   :  { %s2136_s26 = smov [#allocation33]   ;;  %s359_s28 = sshll.u32 %s2319_s6, 4  ;;  %s360_s28 = int_to_ptr.hbm [resolvable:$true] %s359_s28 }
  0xae   :  { %s334_s1 = sshll.u32 %s2136_s26, 4  ;;  %s1705_s2 = sshra.s32 %s2379_s24, 4  ;;  %s335_s1 = int_to_ptr.vmem [resolvable:$true] %s334_s1  ;;  %s1706_s2 = int_to_ptr.hbm [resolvable:$true] %s1705_s2 }
  0xaf   :  { %s1707_s29 = scalar_lea.hbm %s1706_s2, 16  ;;  %s1709_s14 = scalar_lea.hbm %s2304_s17, 16 }
  0xb0   :  { %p1708_p3 = scmp.ne.s32.totalorder %s1706_s2, %s1707_s29  ;;  %p1710_p4 = scmp.lt.s32.totalorder %s1706_s2, %s2304_s17 }
  0xb1   :  { %p1711_p5 = scmp.lt.s32.totalorder %s1709_s14, %s1707_s29 }
  0xb3   :  { %p1712_p6 = por %p1711_p5, %p1710_p4 }
  0xb5   :  { %p1713_p7 = pnand %p1712_p6, %p1708_p3 }
  0xb7   :  { %1716 = shalt.err (!%p1713_p7)
}
  0xb8   :  { %340 = dma.hbm_to_vmem [thread:$0]  %s2379_s24, 256, %s335_s1, [#allocation34], %s2127_s9, %s2127_s9, %s2128_s11  }
  0xb9   :  { %s94_s4 = sshll.u32 %s2166_s5, 4  ;;  %s2137_s0 = smov [#allocation36]   ;;  %s95_s4 = int_to_ptr.hbm [resolvable:$true] %s94_s4 }
  0xba   :  { %s361_s30 = sshll.u32 %s2137_s0, 4  ;;  %s1729_s10 = sshra.s32 %s360_s28, 4  ;;  %s362_s30 = int_to_ptr.vmem [resolvable:$true] %s361_s30  ;;  %s1730_s10 = int_to_ptr.hbm [resolvable:$true] %s1729_s10 }
  0xbb   :  { %s1731_s17 = scalar_lea.hbm %s1730_s10, 1  ;;  %s1733_s12 = scalar_lea.hbm %s2319_s6, 1 }
  0xbc   :  { %p1732_p8 = scmp.ne.s32.totalorder %s1730_s10, %s1731_s17  ;;  %p1734_p9 = scmp.lt.s32.totalorder %s1730_s10, %s2319_s6 }
  0xbd   :  { %p1735_p10 = scmp.lt.s32.totalorder %s1733_s12, %s1731_s17 }
  0xbf   :  { %p1736_p11 = por %p1735_p10, %p1734_p9 }
  0xc1   :  { %p1737_p12 = pnand %p1736_p11, %p1732_p8 }
  0xc3   :  { %1740 = shalt.err (!%p1737_p12)
}
  0xc4   :  { %364 = dma.hbm_to_vmem [thread:$0]  %s360_s28, 16, %s362_s30, [#allocation37]  }
  0xc5   :  { %s2138_s18 = smov [#allocation3]   ;;  %s116_s19 = sshll.u32 %s2176_s13, 4  ;;  %s117_s19 = int_to_ptr.hbm [resolvable:$true] %s116_s19 }
  0xc6   :  { %s96_s23 = sshll.u32 %s2138_s18, 4  ;;  %s1753_s24 = sshra.s32 %s95_s4, 4  ;;  %s97_s23 = int_to_ptr.vmem [resolvable:$true] %s96_s23  ;;  %s1754_s24 = int_to_ptr.hbm [resolvable:$true] %s1753_s24 }
  0xc7   :  { %s1755_s21 = scalar_lea.hbm %s1754_s24, 8  ;;  %s1757_s22 = scalar_lea.hbm %s2166_s5, 8 }
  0xc8   :  { %p1756_p13 = scmp.ne.s32.totalorder %s1754_s24, %s1755_s21  ;;  %p1758_p0 = scmp.lt.s32.totalorder %s1754_s24, %s2166_s5 }
  0xc9   :  { %p1759_p1 = scmp.lt.s32.totalorder %s1757_s22, %s1755_s21 }
  0xcb   :  { %p1760_p2 = por %p1759_p1, %p1758_p0 }
  0xcd   :  { %p1761_p3 = pnand %p1760_p2, %p1756_p13 }
  0xcf   :  { %1764 = shalt.err (!%p1761_p3)
}
  0xd0   :  { %99 = dma.hbm_to_vmem [thread:$0]  %s95_s4, 128, %s97_s23, [#allocation4]  }
  0xd1   :  { %s141_s6 = sshll.u32 %s2191_s25, 4  ;;  %s2139_s15 = smov [#allocation8]   ;;  %s2398_s6 = int_to_ptr.hbm [resolvable:$true] %s141_s6 }
  0xd2   :  { %s118_s3 = sshll.u32 %s2139_s15, 4  ;;  %s1777_s20 = sshra.s32 %s117_s19, 4  ;;  %s119_s3 = int_to_ptr.vmem [resolvable:$true] %s118_s3  ;;  %s1778_s20 = int_to_ptr.hbm [resolvable:$true] %s1777_s20 }
  0xd3   :  { %s1779_s26 = scalar_lea.hbm %s1778_s20, 8  ;;  %s1781_s1 = scalar_lea.hbm %s2176_s13, 8 }
  0xd4   :  { %p1780_p4 = scmp.ne.s32.totalorder %s1778_s20, %s1779_s26  ;;  %p1782_p5 = scmp.lt.s32.totalorder %s1778_s20, %s2176_s13 }
  0xd5   :  { %p1783_p6 = scmp.lt.s32.totalorder %s1781_s1, %s1779_s26 }
  0xd7   :  { %p1784_p7 = por %p1783_p6, %p1782_p5 }
  0xd9   :  { %p1785_p8 = pnand %p1784_p7, %p1780_p4 }
  0xdb   :  { %1788 = shalt.err (!%p1785_p8)
}
  0xdc   :  { %121 = dma.hbm_to_vmem [thread:$0]  %s117_s19, 128, %s119_s3, [#allocation7]  }
  0xdd   :  { %s2637_s5 = sld [smem:[#allocation55_spill]]  ;;  %s2140_s28 = smov [#allocation11]  }
  0xde   :  { %s143_s2 = sshll.u32 %s2140_s28, 4  ;;  %s1801_s14 = sshra.s32 %s2398_s6, 4  ;;  %s144_s2 = int_to_ptr.vmem [resolvable:$true] %s143_s2  ;;  %s1802_s14 = int_to_ptr.hbm [resolvable:$true] %s1801_s14 }
  0xdf   :  { %s1803_s4 = scalar_lea.hbm %s1802_s14, 16  ;;  %s1805_s0 = scalar_lea.hbm %s2191_s25, 16 }
  0xe0   :  { %p1804_p9 = scmp.ne.s32.totalorder %s1802_s14, %s1803_s4  ;;  %p1806_p10 = scmp.lt.s32.totalorder %s1802_s14, %s2191_s25 }
  0xe1   :  { %p1807_p11 = scmp.lt.s32.totalorder %s1805_s0, %s1803_s4 }
  0xe3   :  { %s168_s29 = sshll.u32 %s2637_s5, 4  ;;  %p1808_p12 = por %p1807_p11, %p1806_p10  ;;  %s169_s29 = int_to_ptr.hbm [resolvable:$true] %s168_s29 }
  0xe5   :  { %p1809_p13 = pnand %p1808_p12, %p1804_p9 }
  0xe7   :  { %1812 = shalt.err (!%p1809_p13)
}
  0xe8   :  { %s2638_s13 = sld [smem:[#allocation60_spill]]  ;;  %s2141_s10 = smov [#allocation14]  }
  0xe9   :  { %149 = dma.hbm_to_vmem [thread:$0]  %s2398_s6, 256, %s144_s2, [#allocation10], %s2127_s9, %s2127_s9, %s2128_s11  }
  0xea   :  { %s170_s17 = sshll.u32 %s2141_s10, 4  ;;  %s1825_s12 = sshra.s32 %s169_s29, 4  ;;  %s171_s17 = int_to_ptr.vmem [resolvable:$true] %s170_s17  ;;  %s1826_s12 = int_to_ptr.hbm [resolvable:$true] %s1825_s12 }
  0xeb   :  { %s1827_s25 = scalar_lea.hbm %s1826_s12, 1  ;;  %s1829_s18 = scalar_lea.hbm %s2637_s5, 1 }
  0xec   :  { %p1828_p0 = scmp.ne.s32.totalorder %s1826_s12, %s1827_s25  ;;  %p1830_p1 = scmp.lt.s32.totalorder %s1826_s12, %s2637_s5 }
  0xed   :  { %p1831_p2 = scmp.lt.s32.totalorder %s1829_s18, %s1827_s25 }
  0xee   :  { %s198_s30 = sshll.u32 %s2638_s13, 4  ;;  %s199_s30 = int_to_ptr.hbm [resolvable:$true] %s198_s30 }
  0xef   :  { %p1832_p3 = por %p1831_p2, %p1830_p1 }
  0xf1   :  { %p1833_p4 = pnand %p1832_p3, %p1828_p0 }
  0xf3   :  { %1836 = shalt.err (!%p1833_p4)
}
  0xf4   :  { %173 = dma.hbm_to_vmem [thread:$0]  %s169_s29, 16, %s171_s17, [#allocation13]  }
  0xf5   :  { %s2639_s23 = sld [smem:[#allocation61_spill]]  ;;  %s2142_s19 = smov [#allocation17]  }
  0xf6   :  { %s200_s24 = sshll.u32 %s2142_s19, 4  ;;  %s1849_s22 = sshra.s32 %s199_s30, 4  ;;  %s201_s24 = int_to_ptr.vmem [resolvable:$true] %s200_s24  ;;  %s1850_s22 = int_to_ptr.hbm [resolvable:$true] %s1849_s22 }
  0xf7   :  { %s1851_s6 = scalar_lea.hbm %s1850_s22, 1  ;;  %s1853_s15 = scalar_lea.hbm %s2638_s13, 1 }
  0xf8   :  { %p1852_p5 = scmp.ne.s32.totalorder %s1850_s22, %s1851_s6  ;;  %p1854_p6 = scmp.lt.s32.totalorder %s1850_s22, %s2638_s13 }
  0xf9   :  { %p1855_p7 = scmp.lt.s32.totalorder %s1853_s15, %s1851_s6 }
  0xfb   :  { %s222_s21 = sshll.u32 %s2639_s23, 4  ;;  %p1856_p8 = por %p1855_p7, %p1854_p6  ;;  %s223_s21 = int_to_ptr.hbm [resolvable:$true] %s222_s21 }
  0xfd   :  { %p1857_p9 = pnand %p1856_p8, %p1852_p5 }
  0xff   :  { %1860 = shalt.err (!%p1857_p9)
}
 0x100   :  { %203 = dma.hbm_to_vmem [thread:$0]  %s199_s30, 16, %s201_s24, [#allocation16]  }
 0x101   :  { %s2640_s3 = sld [smem:[#allocation63_spill]]  ;;  %s2143_s26 = smov [#allocation20]  }
 0x102   :  { %s224_s1 = sshll.u32 %s2143_s26, 4  ;;  %s1873_s5 = sshra.s32 %s223_s21, 4  ;;  %s225_s1 = int_to_ptr.vmem [resolvable:$true] %s224_s1  ;;  %s1874_s5 = int_to_ptr.hbm [resolvable:$true] %s1873_s5 }
 0x103   :  { %s1875_s28 = scalar_lea.hbm %s1874_s5, 1  ;;  %s1877_s2 = scalar_lea.hbm %s2639_s23, 1 }
 0x104   :  { %p1876_p10 = scmp.ne.s32.totalorder %s1874_s5, %s1875_s28  ;;  %p1878_p11 = scmp.lt.s32.totalorder %s1874_s5, %s2639_s23 }
 0x105   :  { %p1879_p12 = scmp.lt.s32.totalorder %s1877_s2, %s1875_s28 }
 0x107   :  { %s245_s20 = sshll.u32 %s2640_s3, 4  ;;  %p1880_p13 = por %p1879_p12, %p1878_p11  ;;  %s2417_s20 = int_to_ptr.hbm [resolvable:$true] %s245_s20 }
 0x109   :  { %p1881_p0 = pnand %p1880_p13, %p1876_p10 }
 0x10b   :  { %1884 = shalt.err (!%p1881_p0)
}
 0x10c   :  { %227 = dma.hbm_to_vmem [thread:$0]  %s223_s21, 16, %s225_s1, [#allocation19]  }
 0x10d   :  { %s2641_s29 = sld [smem:[#allocation65_spill]]  ;;  %s2144_s14 = smov [#allocation23]  }
 0x10e   :  { %s247_s4 = sshll.u32 %s2144_s14, 4  ;;  %s1897_s13 = sshra.s32 %s2417_s20, 4  ;;  %s248_s4 = int_to_ptr.vmem [resolvable:$true] %s247_s4  ;;  %s1898_s13 = int_to_ptr.hbm [resolvable:$true] %s1897_s13 }
 0x10f   :  { %s1899_s30 = scalar_lea.hbm %s1898_s13, 96  ;;  %s1901_s10 = scalar_lea.hbm %s2640_s3, 96 }
 0x110   :  { %p1900_p1 = scmp.ne.s32.totalorder %s1898_s13, %s1899_s30  ;;  %p1902_p2 = scmp.lt.s32.totalorder %s1898_s13, %s2640_s3 }
 0x111   :  { %p1903_p3 = scmp.lt.s32.totalorder %s1901_s10, %s1899_s30 }
 0x113   :  { %s272_s0 = sshll.u32 %s2641_s29, 4  ;;  %p1904_p4 = por %p1903_p3, %p1902_p2  ;;  %s273_s0 = int_to_ptr.hbm [resolvable:$true] %s272_s0 }
 0x115   :  { %p1905_p5 = pnand %p1904_p4, %p1900_p1 }
 0x117   :  { %1908 = shalt.err (!%p1905_p5)
}
 0x118   :  { %s2642_s17 = sld [smem:[#allocation66_spill]]  ;;  %s2145_s25 = smov [#allocation26]  }
 0x119   :  { %253 = dma.hbm_to_vmem [thread:$0]  %s2417_s20, 1536, %s248_s4, [#allocation22], %s2127_s9, %s2127_s9, %s2128_s11  }
 0x11a   :  { %s274_s18 = sshll.u32 %s2145_s25, 4  ;;  %s1921_s23 = sshra.s32 %s273_s0, 4  ;;  %s275_s18 = int_to_ptr.vmem [resolvable:$true] %s274_s18  ;;  %s1922_s23 = int_to_ptr.hbm [resolvable:$true] %s1921_s23 }
 0x11b   :  { %s1923_s19 = scalar_lea.hbm %s1922_s23, 1  ;;  %s1925_s24 = scalar_lea.hbm %s2641_s29, 1 }
 0x11c   :  { %p1924_p6 = scmp.ne.s32.totalorder %s1922_s23, %s1923_s19  ;;  %p1926_p7 = scmp.lt.s32.totalorder %s1922_s23, %s2641_s29 }
 0x11d   :  { %p1927_p8 = scmp.lt.s32.totalorder %s1925_s24, %s1923_s19 }
 0x11e   :  { %s296_s12 = sshll.u32 %s2642_s17, 4  ;;  %s297_s12 = int_to_ptr.hbm [resolvable:$true] %s296_s12 }
 0x11f   :  { %p1928_p9 = por %p1927_p8, %p1926_p7 }
 0x121   :  { %p1929_p10 = pnand %p1928_p9, %p1924_p6 }
 0x123   :  { %1932 = shalt.err (!%p1929_p10)
}
 0x124   :  { %277 = dma.hbm_to_vmem [thread:$0]  %s273_s0, 16, %s275_s18, [#allocation25]  }
 0x125   :  { %s2643_s21 = sld [smem:[#allocation67_spill]]  ;;  %s2146_s22 = smov [#allocation29]  }
 0x126   :  { %s298_s6 = sshll.u32 %s2146_s22, 4  ;;  %s1945_s3 = sshra.s32 %s297_s12, 4  ;;  %s299_s6 = int_to_ptr.vmem [resolvable:$true] %s298_s6  ;;  %s1946_s3 = int_to_ptr.hbm [resolvable:$true] %s1945_s3 }
 0x127   :  { %s1947_s20 = scalar_lea.hbm %s1946_s3, 1  ;;  %s1949_s26 = scalar_lea.hbm %s2642_s17, 1 }
 0x128   :  { %p1948_p11 = scmp.ne.s32.totalorder %s1946_s3, %s1947_s20  ;;  %p1950_p12 = scmp.lt.s32.totalorder %s1946_s3, %s2642_s17 }
 0x129   :  { %p1951_p13 = scmp.lt.s32.totalorder %s1949_s26, %s1947_s20 }
 0x12b   :  { %s319_s15 = sshll.u32 %s2643_s21, 4  ;;  %p1952_p0 = por %p1951_p13, %p1950_p12  ;;  %s2433_s15 = int_to_ptr.hbm [resolvable:$true] %s319_s15 }
 0x12d   :  { %p1953_p1 = pnand %p1952_p0, %p1948_p11 }
 0x12f   :  { %1956 = shalt.err (!%p1953_p1)
}
 0x130   :  { %301 = dma.hbm_to_vmem [thread:$0]  %s297_s12, 16, %s299_s6, [#allocation28]  }
 0x131   :  { %s346_s1 = sshll.u32 %s2309_s27, 4  ;;  %s2147_s5 = smov [#allocation32]   ;;  %s347_s1 = int_to_ptr.hbm [resolvable:$true] %s346_s1 }
 0x132   :  { %s321_s28 = sshll.u32 %s2147_s5, 4  ;;  %s1969_s2 = sshra.s32 %s2433_s15, 4  ;;  %s322_s28 = int_to_ptr.vmem [resolvable:$true] %s321_s28  ;;  %s1970_s2 = int_to_ptr.hbm [resolvable:$true] %s1969_s2 }
 0x133   :  { %s1971_s29 = scalar_lea.hbm %s1970_s2, 24  ;;  %s1973_s14 = scalar_lea.hbm %s2643_s21, 24 }
 0x134   :  { %p1972_p2 = scmp.ne.s32.totalorder %s1970_s2, %s1971_s29  ;;  %p1974_p3 = scmp.lt.s32.totalorder %s1970_s2, %s2643_s21 }
 0x135   :  { %p1975_p4 = scmp.lt.s32.totalorder %s1973_s14, %s1971_s29 }
 0x137   :  { %p1976_p5 = por %p1975_p4, %p1974_p3 }
 0x139   :  { %p1977_p6 = pnand %p1976_p5, %p1972_p2 }
 0x13b   :  { %1980 = shalt.err (!%p1977_p6)
}
 0x13c   :  { %327 = dma.hbm_to_vmem [thread:$0]  %s2433_s15, 384, %s322_s28, [#allocation31], %s2127_s9, %s2127_s9, %s2128_s11  }
 0x13d   :  { %s2148_s4 = smov [#allocation35]   ;;  %s372_s13 = sshll.u32 %s2329_s7, 4  ;;  %s373_s13 = int_to_ptr.hbm [resolvable:$true] %s372_s13 }
 0x13e   :  { %s348_s0 = sshll.u32 %s2148_s4, 4  ;;  %s1993_s30 = sshra.s32 %s347_s1, 4  ;;  %s349_s0 = int_to_ptr.vmem [resolvable:$true] %s348_s0  ;;  %s1994_s30 = int_to_ptr.hbm [resolvable:$true] %s1993_s30 }
 0x13f   :  { %s1995_s10 = scalar_lea.hbm %s1994_s30, 1  ;;  %s1997_s17 = scalar_lea.hbm %s2309_s27, 1 }
 0x140   :  { %p1996_p7 = scmp.ne.s32.totalorder %s1994_s30, %s1995_s10  ;;  %p1998_p8 = scmp.lt.s32.totalorder %s1994_s30, %s2309_s27 }
 0x141   :  { %p1999_p9 = scmp.lt.s32.totalorder %s1997_s17, %s1995_s10 }
 0x143   :  { %p2000_p10 = por %p1999_p9, %p1998_p8 }
 0x145   :  { %p2001_p11 = pnand %p2000_p10, %p1996_p7 }
 0x147   :  { %2004 = shalt.err (!%p2001_p11)
}
 0x148   :  { %351 = dma.hbm_to_vmem [thread:$0]  %s347_s1, 16, %s349_s0, [#allocation34]  }
 0x149   :  { %s2149_s12 = smov [#allocation38]   ;;  %s2017_s11 = sshra.s32 %s373_s13, 4  ;;  %s2018_s11 = int_to_ptr.hbm [resolvable:$true] %s2017_s11 }
 0x14a   :  { %s374_s9 = sshll.u32 %s2149_s12, 4  ;;  %s2019_s25 = scalar_lea.hbm %s2018_s11, 1  ;;  %s375_s9 = int_to_ptr.vmem [resolvable:$true] %s374_s9 }
 0x14b   :  { %p2020_p12 = scmp.ne.s32.totalorder %s2018_s11, %s2019_s25  ;;  %s2021_s18 = scalar_lea.hbm %s2329_s7, 1 }
 0x14c   :  { %p2022_p13 = scmp.lt.s32.totalorder %s2018_s11, %s2329_s7  ;;  %p2023_p0 = scmp.lt.s32.totalorder %s2021_s18, %s2019_s25 }
 0x14e   :  { %p2024_p1 = por %p2023_p0, %p2022_p13 }
 0x150   :  { %p2025_p2 = pnand %p2024_p1, %p2020_p12 }
 0x152   :  { %2028 = shalt.err (!%p2025_p2)
}
 0x153   :  { %377 = dma.hbm_to_vmem [thread:$0]  %s373_s13, 16, %s375_s9, [#allocation37]  }
 0x154   :  { %2065 = dma.done.wait [#allocation4], 128  }
 0x155   :  { %2066 = vsyncadd [#allocation4], 4294967168 }
 0x156   :  { %2067 = dma.done.wait [#allocation7], 256  }
 0x157   :  { %2068 = vsyncadd [#allocation7], 4294967040 }
 0x158   :  { %2069 = dma.done.wait [#allocation10], 512  }
 0x159   :  { %2070 = vsyncadd [#allocation10], 4294966784 }
 0x15a   :  { %2071 = dma.done.wait [#allocation13], 32  }
 0x15b   :  { %2072 = vsyncadd [#allocation13], 4294967264 }
 0x15c   :  { %2073 = dma.done.wait [#allocation16], 32  }
 0x15d   :  { %2074 = vsyncadd [#allocation16], 4294967264 }
 0x15e   :  { %2075 = dma.done.wait [#allocation19], 1552  }
 0x15f   :  { %2076 = vsyncadd [#allocation19], 4294965744 }
 0x160   :  { %2077 = dma.done.wait [#allocation22], 1552  }
 0x161   :  { %2078 = vsyncadd [#allocation22], 4294965744 }
 0x162   :  { %2079 = dma.done.wait [#allocation25], 32  }
 0x163   :  { %2080 = vsyncadd [#allocation25], 4294967264 }
 0x164   :  { %2081 = dma.done.wait [#allocation28], 272  }
 0x165   :  { %2082 = vsyncadd [#allocation28], 4294967024 }
 0x166   :  { %2083 = dma.done.wait [#allocation31], 400  }
 0x167   :  { %2084 = vsyncadd [#allocation31], 4294966896 }
 0x168   :  { %2085 = dma.done.wait [#allocation34], 272  }
 0x169   :  { %2086 = vsyncadd [#allocation34], 4294967024 }
 0x16a   :  { %2087 = dma.done.wait [#allocation37], 32  }
 0x16b   :  { %2088 = vsyncadd [#allocation37], 4294967264  ;;  %s2644_s27 = sld [smem:[#allocation53_spill]]  ;;  %v476_v1 = vld [vmem:[#allocation9 + $0x8] sm:$0xff]  ;;  %v475_v2 = vld [vmem:[#allocation9] sm:$0xff]  ;;  %vm477_vm0 = vcmask 130048  }
 0x16c   :  { %495 = vmatpush.msra.mxu0 %v476_v1  ;;  %v471_v3 = vld [vmem:[#allocation6] sm:$0xff]  ;;  %s2645_s7 = sld [smem:[#allocation54_spill]]  ;;  %v525_v4 = vld [vmem:[#allocation11 + $0x8] sm:$0xff]  ;;  %v470_v9 = vld [vmem:[#allocation3] sm:$0xff]  ;;  %vm580_vm1 = vcmask 785408   ;;  %s2150_s22 = smov 48  }
 0x16d   :  { %v524_v5 = vld [vmem:[#allocation11] sm:$0xff]  ;;  %543 = vmatpush.msra.mxu2 %v525_v4  ;;  %v472_v8 = vld [vmem:[#allocation8] sm:$0xff]  ;;  %s2646_s23 = sld [smem:[#allocation56_spill]]  ;;  %v1441_v26 = vld [vmem:[#allocation12] ss:$0 sm:$0xff]  ;;  %s2151_s6 = smov 32  }
 0x16e   :  { %496 = vmatpush.msra.mxu0 %v475_v2  ;;  %s2647_s19 = sld [smem:[#allocation57_spill]]  ;;  %v1442_v50 = vld [vmem:[#allocation14] ss:$0 sm:$0xff]  ;;  %vm1258_vm2 = vcmask 392192   ;;  %vm1270_vm3 = vcmask 916608   ;;  %vm821_vm4 = vcmask 261120  }
 0x16f   :  { %1357 = vmatmul.msk.f32.vlgmr.msra.gmra.mxu0 %vm477_vm0, %v471_v3  ;;  %544 = vmatpush.msra.mxu2 %v524_v5  ;;  %s2648_s24 = sld [smem:[#allocation59_spill]]  ;;  %vm1052_vm5 = vcmask 195584   ;;  %s2153_s3 = smov 96   ;;  %vm1275_vm10 = vcmask 1048448   ;;  %vm1277_vm11 = vcmask 654336   ;;  %vm1282_vm12 = vcmask 786048  }
 0x170   :  { %1359 = vmatmul.msk.f32.vlgmr.msra.gmra.mxu2 %vm477_vm0, %v472_v8  ;;  %s2649_s21 = sld [smem:[#allocation58_spill]]  ;;  %s2154_s1 = smov 80   ;;  %vm1287_vm13 = vcmask 982784  }
 0x171   :  { %v474_v6 = vld [vmem:[%s2644_s27 + $0x8] sm:$0xff]  ;;  %v473_v7 = vld [vmem:[%s2644_s27] sm:$0xff]  ;;  %s2650_s15 = sld [smem:[#allocation62_spill]]  ;;  %s2155_s5 = smov 112  }
 0x172   :  { %518 = vmatpush.msrb.mxu0 %v474_v6  ;;  %v575_v10 = vld [vmem:[%s2645_s7 + $0x58] sm:$0xff]  ;;  %v574_v11 = vld [vmem:[%s2645_s7 + $0x50] sm:$0xff]  ;;  %v573_v12 = vld [vmem:[%s2645_s7 + $0x48] sm:$0xff]  ;;  %s2651_s20 = sld [smem:[#allocation64_spill]]  ;;  %s2157_s28 = smov [#allocation39]  }
 0x173   :  { %588 = vmatpush.msra.mxu3 %v575_v10  ;;  %v572_v13 = vld [vmem:[%s2645_s7 + $0x40] sm:$0xff]  ;;  %v571_v14 = vld [vmem:[%s2645_s7 + $0x38] sm:$0xff]  ;;  %v570_v15 = vld [vmem:[%s2645_s7 + $0x30] sm:$0xff]  ;;  %s2652_s26 = sld [smem:[#allocation68_spill]]  ;;  %s1300_s2 = sshll.u32 %s2157_s28, 4  ;;  %s1301_s2 = int_to_ptr.vmem [resolvable:$true] %s1300_s2 }
 0x174   :  { %519 = vmatpush.msrb.mxu0 %v473_v7  ;;  %v569_v16 = vld [vmem:[%s2645_s7 + $0x28] sm:$0xff]  ;;  %v568_v17 = vld [vmem:[%s2645_s7 + $0x20] sm:$0xff]  ;;  %v567_v18 = vld [vmem:[%s2645_s7 + $0x18] sm:$0xff]  ;;  %s1302_s29 = sshll.u32 %s2334_s16, 4  ;;  %s2057_s0 = scalar_lea.hbm %s2334_s16, 24  ;;  %s1303_s29 = int_to_ptr.hbm [resolvable:$true] %s1302_s29 }
 0x175   :  { %589 = vmatpush.msra.mxu3 %v574_v11  ;;  %v566_v19 = vld [vmem:[%s2645_s7 + $0x10] sm:$0xff]  ;;  %v565_v20 = vld [vmem:[%s2645_s7 + $0x8] sm:$0xff]  ;;  %v564_v22 = vld [vmem:[%s2645_s7] sm:$0xff]  ;;  %s2053_s14 = sshra.s32 %s1303_s29, 4  ;;  %s2054_s14 = int_to_ptr.hbm [resolvable:$true] %s2053_s14 }
 0x176   :  { %v624_v38 = vld [vmem:[%s2646_s23 + $0x58] sm:$0xff]  ;;  %v623_v39 = vld [vmem:[%s2646_s23 + $0x50] sm:$0xff]  ;;  %v622_v40 = vld [vmem:[%s2646_s23 + $0x48] sm:$0xff]  ;;  %s2055_s4 = scalar_lea.hbm %s2054_s14, 24  ;;  %p2058_p4 = scmp.lt.s32.totalorder %s2054_s14, %s2334_s16 }
 0x177   :  { %1358 = vmatmul.msk.f32.vlgmr.msrb.gmra.mxu0 %vm477_vm0, %v470_v9  ;;  %590 = vmatpush.msra.mxu3 %v573_v12  ;;  %v621_v41 = vld [vmem:[%s2646_s23 + $0x40] sm:$0xff]  ;;  %v620_v42 = vld [vmem:[%s2646_s23 + $0x38] sm:$0xff]  ;;  %v619_v43 = vld [vmem:[%s2646_s23 + $0x30] sm:$0xff]  ;;  %p2056_p3 = scmp.ne.s32.totalorder %s2054_s14, %s2055_s4  ;;  %p2059_p5 = scmp.lt.s32.totalorder %s2057_s0, %s2055_s4 }
 0x178   :  { %636 = vmatpush.msra.mxu0 %v624_v38  ;;  %v618_v44 = vld [vmem:[%s2646_s23 + $0x28] sm:$0xff]  ;;  %v617_v45 = vld [vmem:[%s2646_s23 + $0x20] sm:$0xff]  ;;  %v616_v46 = vld [vmem:[%s2646_s23 + $0x18] sm:$0xff] }
 0x179   :  { %591 = vmatpush.msra.mxu3 %v572_v13  ;;  %v615_v47 = vld [vmem:[%s2646_s23 + $0x10] sm:$0xff]  ;;  %v614_v48 = vld [vmem:[%s2646_s23 + $0x8] sm:$0xff]  ;;  %v613_v49 = vld [vmem:[%s2646_s23] sm:$0xff]  ;;  %p2060_p6 = por %p2059_p5, %p2058_p4 }
 0x17a   :  { %637 = vmatpush.msra.mxu0 %v623_v39  ;;  %v683_v62 = vld [vmem:[%s2647_s19 + $0xb0] sm:$0xff]  ;;  %v684_v63 = vld [vmem:[%s2647_s19 + $0xb8] sm:$0xff]  ;;  %v681_v0 = vld [vmem:[%s2647_s19 + $0xa0] sm:$0xff] }
 0x17b   :  { %592 = vmatpush.msra.mxu3 %v571_v14  ;;  %698 = vmatpush.msra.mxu1 %v683_v62  ;;  %v682_v1 = vld [vmem:[%s2647_s19 + $0xa8] sm:$0xff]  ;;  %v679_v2 = vld [vmem:[%s2647_s19 + $0x90] sm:$0xff]  ;;  %v680_v3 = vld [vmem:[%s2647_s19 + $0x98] sm:$0xff]  ;;  %p2061_p7 = pnand %p2060_p6, %p2056_p3 }
 0x17c   :  { %638 = vmatpush.msra.mxu0 %v622_v40  ;;  %718 = vmatpush.msrb.mxu2 %v684_v63  ;;  %v677_v4 = vld [vmem:[%s2647_s19 + $0x80] sm:$0xff]  ;;  %v678_v5 = vld [vmem:[%s2647_s19 + $0x88] sm:$0xff]  ;;  %v675_v6 = vld [vmem:[%s2647_s19 + $0x70] sm:$0xff] }
 0x17d   :  { %593 = vmatpush.msra.mxu3 %v570_v15  ;;  %699 = vmatpush.msra.mxu1 %v681_v0  ;;  %v676_v7 = vld [vmem:[%s2647_s19 + $0x78] sm:$0xff]  ;;  %v673_v8 = vld [vmem:[%s2647_s19 + $0x60] sm:$0xff]  ;;  %v674_v9 = vld [vmem:[%s2647_s19 + $0x68] sm:$0xff] }
 0x17e   :  { %639 = vmatpush.msra.mxu0 %v621_v41  ;;  %719 = vmatpush.msrb.mxu2 %v682_v1  ;;  %v671_v10 = vld [vmem:[%s2647_s19 + $0x50] sm:$0xff]  ;;  %v672_v11 = vld [vmem:[%s2647_s19 + $0x58] sm:$0xff]  ;;  %v669_v12 = vld [vmem:[%s2647_s19 + $0x40] sm:$0xff] }
 0x17f   :  { %594 = vmatpush.msra.mxu3 %v569_v16  ;;  %700 = vmatpush.msra.mxu1 %v679_v2  ;;  %v670_v13 = vld [vmem:[%s2647_s19 + $0x48] sm:$0xff]  ;;  %v667_v14 = vld [vmem:[%s2647_s19 + $0x30] sm:$0xff]  ;;  %v668_v15 = vld [vmem:[%s2647_s19 + $0x38] sm:$0xff] }
 0x180   :  { %640 = vmatpush.msra.mxu0 %v620_v42  ;;  %720 = vmatpush.msrb.mxu2 %v680_v3  ;;  %v665_v16 = vld [vmem:[%s2647_s19 + $0x20] sm:$0xff]  ;;  %v759_v38 = vld [vmem:[%s2648_s24 + $0x38] sm:$0xff]  ;;  %v758_v39 = vld [vmem:[%s2648_s24 + $0x30] sm:$0xff] }
 0x181   :  { %595 = vmatpush.msra.mxu3 %v568_v17  ;;  %701 = vmatpush.msra.mxu1 %v677_v4  ;;  %v666_v17 = vld [vmem:[%s2647_s19 + $0x28] sm:$0xff]  ;;  %v756_v41 = vld [vmem:[%s2648_s24 + $0x20] sm:$0xff]  ;;  %v755_v42 = vld [vmem:[%s2648_s24 + $0x18] sm:$0xff] }
 0x182   :  { %641 = vmatpush.msra.mxu0 %v619_v43  ;;  %721 = vmatpush.msrb.mxu2 %v678_v5  ;;  %v757_v40 = vld [vmem:[%s2648_s24 + $0x28] sm:$0xff]  ;;  %v754_v43 = vld [vmem:[%s2648_s24 + $0x10] sm:$0xff] }
 0x183   :  { %596 = vmatpush.msra.mxu3 %v567_v18  ;;  %702 = vmatpush.msra.mxu1 %v675_v6  ;;  %v663_v18 = vld [vmem:[%s2647_s19 + $0x10] sm:$0xff] }
 0x184   :  { %642 = vmatpush.msra.mxu0 %v618_v44  ;;  %722 = vmatpush.msrb.mxu2 %v676_v7  ;;  %v753_v44 = vld [vmem:[%s2648_s24 + $0x8] sm:$0xff]  ;;  %v811_v7 = vld [vmem:[#allocation18 + $0x58] sm:$0xff] }
 0x185   :  { %597 = vmatpush.msra.mxu3 %v566_v19  ;;  %703 = vmatpush.msra.mxu1 %v673_v8  ;;  %v664_v19 = vld [vmem:[%s2647_s19 + $0x18] sm:$0xff] }
 0x186   :  { %643 = vmatpush.msra.mxu0 %v617_v45  ;;  %723 = vmatpush.msrb.mxu2 %v674_v9  ;;  %v752_v45 = vld [vmem:[%s2648_s24] sm:$0xff]  ;;  %v810_v8 = vld [vmem:[#allocation18 + $0x50] sm:$0xff]  ;;  %v809_v9 = vld [vmem:[#allocation18 + $0x48] sm:$0xff] }
 0x187   :  { %598 = vmatpush.msra.mxu3 %v565_v20  ;;  %704 = vmatpush.msra.mxu1 %v671_v10  ;;  %v661_v20 = vld [vmem:[%s2647_s19] sm:$0xff] }
 0x188   :  { %644 = vmatpush.msra.mxu0 %v616_v46  ;;  %724 = vmatpush.msrb.mxu2 %v672_v11  ;;  %v685_v46 = vld [vmem:[%s2649_s21] sm:$0x3] }
 0x189   :  { %599 = vmatpush.msra.mxu3 %v564_v22  ;;  %705 = vmatpush.msra.mxu1 %v669_v12  ;;  %v1443_v22 = vld [vmem:[#allocation15] ss:$0 sm:$0xff]  ;;  %v808_v10 = vld [vmem:[#allocation18 + $0x40] sm:$0xff]  ;;  %v806_v12 = vld [vmem:[#allocation18 + $0x30] sm:$0xff] }
 0x18a   :  { %645 = vmatpush.msra.mxu0 %v615_v47  ;;  %725 = vmatpush.msrb.mxu2 %v670_v13  ;;  %v687_v47 = vperm.slane %v685_v46, 0  ;;  %v807_v11 = vld [vmem:[#allocation18 + $0x38] sm:$0xff]  ;;  %v805_v13 = vld [vmem:[#allocation18 + $0x28] sm:$0xff] }
 0x18b   :  { %706 = vmatpush.msra.mxu1 %v667_v14  ;;  %v804_v14 = vld [vmem:[#allocation18 + $0x20] sm:$0xff] }
 0x18c   :  { %646 = vmatpush.msra.mxu0 %v614_v48  ;;  %726 = vmatpush.msrb.mxu2 %v668_v15  ;;  %v803_v15 = vld [vmem:[#allocation18 + $0x18] sm:$0xff] }
 0x18d   :  { %707 = vmatpush.msra.mxu1 %v665_v16  ;;  %v802_v16 = vld [vmem:[#allocation18 + $0x10] sm:$0xff] }
 0x18e   :  { %647 = vmatpush.msra.mxu0 %v613_v49  ;;  %727 = vmatpush.msrb.mxu2 %v666_v17  ;;  %v801_v17 = vld [vmem:[#allocation18 + $0x8] sm:$0xff] }
 0x18f   :  { %708 = vmatpush.msra.mxu1 %v663_v18 }
 0x190   :  { %728 = vmatpush.msrb.mxu2 %v664_v19  ;;  %829 = vmatpush.msrb.mxu0 %v811_v7  ;;  %v800_v19 = vld [vmem:[#allocation18] sm:$0xff] }
 0x191   :  { %709 = vmatpush.msra.mxu1 %v661_v20 }
 0x192   :  { %830 = vmatpush.msrb.mxu0 %v810_v8 }
 0x194   :  { %831 = vmatpush.msrb.mxu0 %v809_v9 }
 0x196   :  { %832 = vmatpush.msrb.mxu0 %v808_v10 }
 0x198   :  { %833 = vmatpush.msrb.mxu0 %v807_v11  ;;  %v865_v11 = vld [vmem:[%s2650_s15 + $0x58] sm:$0xff] }
 0x19a   :  { %834 = vmatpush.msrb.mxu0 %v806_v12  ;;  %v864_v12 = vld [vmem:[%s2650_s15 + $0x50] sm:$0xff] }
 0x19c   :  { %835 = vmatpush.msrb.mxu0 %v805_v13  ;;  %v863_v13 = vld [vmem:[%s2650_s15 + $0x48] sm:$0xff] }
 0x19e   :  { %836 = vmatpush.msrb.mxu0 %v804_v14  ;;  %v862_v14 = vld [vmem:[%s2650_s15 + $0x40] sm:$0xff] }
 0x1a0   :  { %837 = vmatpush.msrb.mxu0 %v803_v15  ;;  %v861_v15 = vld [vmem:[%s2650_s15 + $0x38] sm:$0xff] }
 0x1a2   :  { %838 = vmatpush.msrb.mxu0 %v802_v16  ;;  %v860_v16 = vld [vmem:[%s2650_s15 + $0x30] sm:$0xff] }
 0x1a4   :  { %839 = vmatpush.msrb.mxu0 %v801_v17  ;;  %v859_v17 = vld [vmem:[%s2650_s15 + $0x28] sm:$0xff] }
 0x1a6   :  { %840 = vmatpush.msrb.mxu0 %v800_v19  ;;  %v858_v19 = vld [vmem:[%s2650_s15 + $0x20] sm:$0xff] }
 0x1ec   :  { %v498_v21 = vpop.f32.mrf.mxu0 }
 0x1f3   :  { %v546_v24 = vpop.f32.mrf.mxu2 }
 0x1f4   :  { %v521_v23 = vpop.f32.mrf.mxu0 }
 0x1f5   :  { %v522_v25 = vadd.f32 %v521_v23, %v498_v21  ;;  %v662_v21 = vld [vmem:[%s2647_s19 + $0x8] sm:$0xff] }
 0x1f6   :  { %729 = vmatpush.msrb.mxu2 %v662_v21 }
 0x1f7   :  { %v549_v27 = vadd.f32 %v546_v24, %v522_v25 }
 0x1f9   :  { %v554_v28 = vadd.f32 %v1441_v26, %v549_v27 }
 0x1fb   :  { %v556_v29 = vmul.f32 0.044715, %v554_v28  ;;  %v555_v35 = vmul.f32 0.5, %v554_v28 }
 0x1fd   :  { %v557_v30 = vmul.f32 %v556_v29, %v554_v28 }
 0x1ff   :  { %v558_v31 = vmul.f32 %v557_v30, %v554_v28 }
 0x201   :  { %v559_v32 = vadd.f32 %v558_v31, %v554_v28 }
 0x203   :  { %v560_v33 = vmul.f32 0.7978846, %v559_v32 }
 0x205   :  { %1455 = vtanh.f32 %v560_v33 }
 0x20b   :  { %v1456_v34 = vpop.eup %1455 }
 0x20c   :  { %v562_v36 = vadd.f32 1.0, %v1456_v34  ;;  %v763_v34 = vld [vmem:[%s2648_s24 + $0x58] sm:$0xff] }
 0x20d   :  { %775 = vmatpush.msrb.mxu3 %v763_v34 }
 0x20e   :  { %v563_v37 = vmul.f32 %v562_v36, %v555_v35  ;;  %v762_v35 = vld [vmem:[%s2648_s24 + $0x50] sm:$0xff]  ;;  %v761_v36 = vld [vmem:[%s2648_s24 + $0x48] sm:$0xff] }
 0x20f   :  { %776 = vmatpush.msrb.mxu3 %v762_v35 }
 0x210   :  { %1360 = vmatmul.msk.f32.vlgmr.msra.gmra.mxu3 %vm580_vm1, %v563_v37  ;;  %v760_v37 = vld [vmem:[%s2648_s24 + $0x40] sm:$0xff] }
 0x211   :  { %777 = vmatpush.msrb.mxu3 %v761_v36 }
 0x213   :  { %778 = vmatpush.msrb.mxu3 %v760_v37 }
 0x215   :  { %779 = vmatpush.msrb.mxu3 %v759_v38 }
 0x217   :  { %780 = vmatpush.msrb.mxu3 %v758_v39 }
 0x219   :  { %781 = vmatpush.msrb.mxu3 %v757_v40 }
 0x21b   :  { %782 = vmatpush.msrb.mxu3 %v756_v41 }
 0x21d   :  { %783 = vmatpush.msrb.mxu3 %v755_v42 }
 0x21f   :  { %784 = vmatpush.msrb.mxu3 %v754_v43 }
 0x221   :  { %785 = vmatpush.msrb.mxu3 %v753_v44 }
 0x223   :  { %786 = vmatpush.msrb.mxu3 %v752_v45 }
 0x293   :  { %v601_v51 = vpop.f32.mrf.mxu3 }
 0x294   :  { %v602_v52 = vadd.f32 %v1442_v50, %v601_v51  ;;  %v688_v51 = vperm.slane %v685_v46, 1 }
 0x296   :  { %v605_v53 = vmul.f32 0.044715, %v602_v52  ;;  %v604_v59 = vmul.f32 0.5, %v602_v52 }
 0x298   :  { %v606_v54 = vmul.f32 %v605_v53, %v602_v52 }
 0x29a   :  { %v607_v55 = vmul.f32 %v606_v54, %v602_v52 }
 0x29c   :  { %v608_v56 = vadd.f32 %v607_v55, %v602_v52 }
 0x29e   :  { %v609_v57 = vmul.f32 0.7978846, %v608_v56 }
 0x2a0   :  { %1457 = vtanh.f32 %v609_v57 }
 0x2a6   :  { %v1458_v58 = vpop.eup %1457 }
 0x2a7   :  { %v611_v60 = vadd.f32 1.0, %v1458_v58 }
 0x2a9   :  { %v612_v61 = vmul.f32 %v611_v60, %v604_v59 }
 0x2ab   :  { %1361 = vmatmul.msk.f32.vlgmr.msra.gmra.mxu0 %vm580_vm1, %v612_v61 }
 0x328   :  { %v649_v23 = vpop.f32.mrf.mxu0 }
 0x329   :  { %v650_v24 = vadd.f32 %v1443_v22, %v649_v23 }
 0x32b   :  { %v653_v25 = vmul.f32 0.044715, %v650_v24  ;;  %v652_v31 = vmul.f32 0.5, %v650_v24 }
 0x32d   :  { %v654_v26 = vmul.f32 %v653_v25, %v650_v24  ;;  %v1444_v25 = vld [vmem:[#allocation17] ss:$0 sm:$0xff] }
 0x32f   :  { %v655_v27 = vmul.f32 %v654_v26, %v650_v24 }
 0x331   :  { %v656_v28 = vadd.f32 %v655_v27, %v650_v24 }
 0x333   :  { %v657_v29 = vmul.f32 0.7978846, %v656_v28 }
 0x335   :  { %1459 = vtanh.f32 %v657_v29 }
 0x33b   :  { %v1460_v30 = vpop.eup %1459 }
 0x33c   :  { %v659_v32 = vadd.f32 1.0, %v1460_v30 }
 0x33e   :  { %v660_v33 = vmul.f32 %v659_v32, %v652_v31  ;;  %v2152_v32 = vmov 8.0  }
 0x340   :  { %1362 = vmatmul.msk.f32.vlgmr.msra.gmra.mxu1 %vm580_vm1, %v660_v33  ;;  %1363 = vmatmul.msk.f32.vlgmr.msrb.gmra.mxu2 %vm580_vm1, %v660_v33 }
 0x3bd   :  { %v711_v48 = vpop.f32.mrf.mxu1 }
 0x3be   :  { %v712_v49 = vadd.f32 %v711_v48, %v687_v47 }
 0x3c0   :  { %v736_v50 = vmul.f32 0.044715, %v712_v49  ;;  %v734_v0 = vmul.f32 0.5, %v712_v49 }
 0x3c2   :  { %v738_v52 = vmul.f32 %v736_v50, %v712_v49 }
 0x3c3   :  { %v731_v53 = vpop.f32.mrf.mxu2 }
 0x3c4   :  { %v732_v54 = vadd.f32 %v731_v53, %v688_v51  ;;  %v740_v55 = vmul.f32 %v738_v52, %v712_v49 }
 0x3c6   :  { %v737_v56 = vmul.f32 0.044715, %v732_v54  ;;  %v742_v57 = vadd.f32 %v740_v55, %v712_v49  ;;  %v735_v5 = vmul.f32 0.5, %v732_v54 }
 0x3c8   :  { %v744_v58 = vmul.f32 0.7978846, %v742_v57  ;;  %v739_v59 = vmul.f32 %v737_v56, %v732_v54 }
 0x3ca   :  { %1461 = vtanh.f32 %v744_v58  ;;  %v741_v60 = vmul.f32 %v739_v59, %v732_v54  ;;  %v869_v58 = vld [vmem:[%s2650_s15 + $0x78] sm:$0xff]  ;;  %v868_v59 = vld [vmem:[%s2650_s15 + $0x70] sm:$0xff] }
 0x3cb   :  { %874 = vmatpush.msrb.mxu1 %v869_v58 }
 0x3cc   :  { %v743_v61 = vadd.f32 %v741_v60, %v732_v54 }
 0x3cd   :  { %875 = vmatpush.msrb.mxu1 %v868_v59  ;;  %v951_v59 = vld [vmem:[%s2651_s20 + $0x40] sm:$0xff] }
 0x3ce   :  { %v745_v62 = vmul.f32 0.7978846, %v743_v61  ;;  %v867_v61 = vld [vmem:[%s2650_s15 + $0x68] sm:$0xff] }
 0x3cf   :  { %876 = vmatpush.msrb.mxu1 %v867_v61  ;;  %v950_v61 = vld [vmem:[%s2651_s20 + $0x38] sm:$0xff] }
 0x3d0   :  { %v1462_v63 = vpop.eup %1461  ;;  %1463 = vtanh.f32 %v745_v62 }
 0x3d1   :  { %v748_v1 = vadd.f32 1.0, %v1462_v63  ;;  %1465 = vrcp.f32 %v2152_v32  ;;  %v866_v63 = vld [vmem:[%s2650_s15 + $0x60] sm:$0xff] }
 0x3d2   :  { %877 = vmatpush.msrb.mxu1 %v866_v63  ;;  %v949_v63 = vld [vmem:[%s2651_s20 + $0x30] sm:$0xff] }
 0x3d3   :  { %v750_v2 = vmul.f32 %v748_v1, %v734_v0 }
 0x3d4   :  { %878 = vmatpush.msrb.mxu1 %v865_v11  ;;  %v944_v11 = vld [vmem:[%s2651_s20 + $0x8] sm:$0xff] }
 0x3d5   :  { %1260 = vrot.lane.b32.xlu2 %v750_v2, %s2150_s22  ;;  %817 = vrot.lane.b32.xlu0 %v750_v2, %s2151_s6 }
 0x3d6   :  { %v1464_v3 = vpop.eup %1463  ;;  %1364 = vmatmul.msk.f32.vlgmr.msrb.gmra.mxu3 %vm580_vm1, %v750_v2  ;;  %879 = vmatpush.msrb.mxu1 %v864_v12  ;;  %v943_v12 = vld [vmem:[%s2651_s20] sm:$0xff] }
 0x3d7   :  { %v749_v4 = vadd.f32 1.0, %v1464_v3  ;;  %v1466_v34 = vpop.eup %1465 }
 0x3d8   :  { %v1061_v35 = vmul.f32 8.0, %v1466_v34  ;;  %vm1065_vm6 = vweird.f32 %v1466_v34  ;;  %880 = vmatpush.msrb.mxu1 %v863_v13  ;;  %v984_v13 = vld [vmem:[#allocation27 + $0x8] sm:$0xff] }
 0x3d9   :  { %v751_v6 = vmul.f32 %v749_v4, %v735_v5  ;;  %1006 = vmatpush.msra.mxu0 %v984_v13  ;;  %v1204_v13 = vld [vmem:[%s2324_s8 + $0x20] sm:$0xff] }
 0x3da   :  { %v1062_v40 = vsub.f32 1.0, %v1061_v35  ;;  %881 = vmatpush.msrb.mxu1 %v862_v14  ;;  %v1094_v14 = vld [vmem:[#allocation33 + $0x8] sm:$0xff] }
 0x3dc   :  { %v1063_v43 = vmul.f32 %v1466_v34, %v1062_v40  ;;  %882 = vmatpush.msrb.mxu1 %v861_v15  ;;  %v910_v40 = vld [vmem:[#allocation23 + $0x38] sm:$0xff]  ;;  %v983_v15 = vld [vmem:[#allocation27] sm:$0xff] }
 0x3dd   :  { %1266 = vrot.lane.b32.xlu2 %v751_v6, %s2150_s22  ;;  %819 = vrot.lane.b32.xlu0 %v751_v6, %s2151_s6 }
 0x3de   :  { %v1064_v46 = vadd.f32 %v1466_v34, %v1063_v43  ;;  %883 = vmatpush.msrb.mxu1 %v860_v16  ;;  %v907_v43 = vld [vmem:[#allocation23 + $0x20] sm:$0xff]  ;;  %1007 = vmatpush.msra.mxu0 %v983_v15  ;;  %v1203_v15 = vld [vmem:[%s2324_s8 + $0x18] sm:$0xff] }
 0x3df   :  { %v1447_v16 = vld [vmem:[#allocation24] ss:$0 sm:$0xff] }
 0x3e0   :  { %v1066_v49 = vsel %vm1065_vm6, %v1466_v34, %v1064_v46  ;;  %884 = vmatpush.msrb.mxu1 %v859_v17  ;;  %v904_v46 = vld [vmem:[#allocation23 + $0x8] sm:$0xff] }
 0x3e2   :  { %885 = vmatpush.msrb.mxu1 %v858_v19 }
 0x42f   :  { %v2521_v18 = vpop.permute.xlu2 %1260 }
 0x430   :  { %1265 = vst.msk [vmem:[#allocation39 + $0x8] sm:$0xff] %vm477_vm0, %v2521_v18 }
 0x437   :  { %v1267_v20 = vpop.permute.xlu2 %1266 }
 0x438   :  { %v1268_v21 = vsel %vm1258_vm2, %v2521_v18, %v1267_v20  ;;  %v857_v20 = vld [vmem:[%s2650_s15 + $0x18] sm:$0xff] }
 0x439   :  { %1271 = vst.msk [vmem:[#allocation39 + $0x8] sm:$0xff] %vm1270_vm3, %v1268_v21  ;;  %v856_v21 = vld [vmem:[%s2650_s15 + $0x10] sm:$0xff]  ;;  %886 = vmatpush.msrb.mxu1 %v857_v20 }
 0x43b   :  { %887 = vmatpush.msrb.mxu1 %v856_v21  ;;  %v1093_v21 = vld [vmem:[#allocation33] sm:$0xff] }
 0x447   :  { %v818_v22 = vpop.permute.xlu0 %817 }
 0x44f   :  { %v820_v23 = vpop.permute.xlu0 %819 }
 0x450   :  { %v822_v24 = vsel %vm821_vm4, %v818_v22, %v820_v23  ;;  %v855_v22 = vld [vmem:[%s2650_s15 + $0x8] sm:$0xff]  ;;  %v854_v23 = vld [vmem:[%s2650_s15] sm:$0xff]  ;;  %vm1293_vm4 = vcmask 991168  }
 0x451   :  { %1365 = vmatmul.msk.f32.vlgmr.msrb.gmra.mxu0 %vm580_vm1, %v822_v24  ;;  %888 = vmatpush.msrb.mxu1 %v855_v22  ;;  %v1445_v24 = vld [vmem:[#allocation20] ss:$0 sm:$0xff]  ;;  %v1092_v22 = vld [vmem:[#allocation32 + $0x10] sm:$0xff] }
 0x452   :  { %1131 = vmatpush.msrb.mxu0 %v1092_v22 }
 0x453   :  { %889 = vmatpush.msrb.mxu1 %v854_v23  ;;  %v1091_v23 = vld [vmem:[#allocation32 + $0x8] sm:$0xff] }
 0x454   :  { %1132 = vmatpush.msrb.mxu0 %v1091_v23  ;;  %v1453_v23 = vld [vmem:[#allocation36] ss:$0 sm:$0xff] }
 0x459   :  { %v788_v26 = vpop.f32.mrf.mxu3 }
 0x45a   :  { %v789_v27 = vadd.f32 %v1444_v25, %v788_v26 }
 0x45c   :  { %v792_v28 = vmul.f32 0.044715, %v789_v27  ;;  %v791_v37 = vmul.f32 0.5, %v789_v27 }
 0x45e   :  { %v793_v29 = vmul.f32 %v792_v28, %v789_v27 }
 0x460   :  { %v794_v30 = vmul.f32 %v793_v29, %v789_v27 }
 0x462   :  { %v795_v31 = vadd.f32 %v794_v30, %v789_v27 }
 0x464   :  { %v796_v33 = vmul.f32 0.7978846, %v795_v31 }
 0x466   :  { %1467 = vtanh.f32 %v796_v33 }
 0x46c   :  { %v1468_v36 = vpop.eup %1467 }
 0x46d   :  { %v798_v38 = vadd.f32 1.0, %v1468_v36  ;;  %v914_v36 = vld [vmem:[#allocation23 + $0x58] sm:$0xff] }
 0x46e   :  { %926 = vmatpush.msra.mxu2 %v914_v36  ;;  %v1154_v36 = vld [vmem:[%s2652_s26 + $0x10] sm:$0xff] }
 0x46f   :  { %v799_v39 = vmul.f32 %v798_v38, %v791_v37  ;;  %v913_v37 = vld [vmem:[#allocation23 + $0x50] sm:$0xff]  ;;  %v912_v38 = vld [vmem:[#allocation23 + $0x48] sm:$0xff] }
 0x470   :  { %927 = vmatpush.msra.mxu2 %v913_v37  ;;  %v1449_v37 = vld [vmem:[#allocation29] ss:$0 sm:$0xff] }
 0x471   :  { %v1053_v41 = vsel %vm1052_vm5, %v799_v39, 0.0 }
 0x472   :  { %v1054_v42 = vrot.slane %v1053_v41, 4  ;;  %928 = vmatpush.msra.mxu2 %v912_v38  ;;  %v1153_v38 = vld [vmem:[%s2652_s26 + $0x8] sm:$0xff] }
 0x474   :  { %v1055_v44 = vadd.f32 %v1054_v42, %v1053_v41  ;;  %v909_v41 = vld [vmem:[#allocation23 + $0x30] sm:$0xff]  ;;  %v908_v42 = vld [vmem:[#allocation23 + $0x28] sm:$0xff] }
 0x476   :  { %v1056_v45 = vrot.slane %v1055_v44, 2 }
 0x478   :  { %v1057_v47 = vadd.f32 %v1056_v45, %v1055_v44  ;;  %v906_v44 = vld [vmem:[#allocation23 + $0x18] sm:$0xff]  ;;  %v905_v45 = vld [vmem:[#allocation23 + $0x10] sm:$0xff] }
 0x47a   :  { %v1058_v48 = vrot.slane %v1057_v47, 1 }
 0x47c   :  { %v1059_v50 = vadd.f32 %v1058_v48, %v1057_v47  ;;  %v903_v47 = vld [vmem:[#allocation23] sm:$0xff]  ;;  %v958_v48 = vld [vmem:[%s2651_s20 + $0x78] sm:$0xff] }
 0x47d   :  { %963 = vmatpush.msra.mxu3 %v958_v48 }
 0x47e   :  { %v1067_v51 = vmul.f32 %v1066_v49, %v1059_v50  ;;  %v956_v50 = vld [vmem:[%s2651_s20 + $0x68] sm:$0xff] }
 0x480   :  { %v1068_v52 = vsub.f32 %v799_v39, %v1067_v51  ;;  %v911_v39 = vld [vmem:[#allocation23 + $0x40] sm:$0xff] }
 0x481   :  { %929 = vmatpush.msra.mxu2 %v911_v39  ;;  %v955_v51 = vld [vmem:[%s2651_s20 + $0x60] sm:$0xff] }
 0x482   :  { %v1069_v53 = vmul.f32 %v1068_v52, %v1068_v52  ;;  %v1152_v39 = vld [vmem:[%s2652_s26] sm:$0xff] }
 0x483   :  { %930 = vmatpush.msra.mxu2 %v910_v40 }
 0x484   :  { %v1070_v54 = vsel %vm1052_vm5, %v1069_v53, 0.0  ;;  %v954_v53 = vld [vmem:[%s2651_s20 + $0x58] sm:$0xff] }
 0x485   :  { %v1071_v55 = vrot.slane %v1070_v54, 4  ;;  %931 = vmatpush.msra.mxu2 %v909_v41 }
 0x487   :  { %v1072_v56 = vadd.f32 %v1071_v55, %v1070_v54  ;;  %932 = vmatpush.msra.mxu2 %v908_v42  ;;  %v953_v55 = vld [vmem:[%s2651_s20 + $0x50] sm:$0xff] }
 0x489   :  { %v1073_v57 = vrot.slane %v1072_v56, 2  ;;  %933 = vmatpush.msra.mxu2 %v907_v43 }
 0x48b   :  { %v1074_v60 = vadd.f32 %v1073_v57, %v1072_v56  ;;  %934 = vmatpush.msra.mxu2 %v906_v44  ;;  %v952_v57 = vld [vmem:[%s2651_s20 + $0x48] sm:$0xff]  ;;  %v1450_v44 = vld [vmem:[#allocation35] ss:$0 sm:$0xff] }
 0x48d   :  { %v1075_v62 = vrot.slane %v1074_v60, 1  ;;  %935 = vmatpush.msra.mxu2 %v905_v45 }
 0x48f   :  { %v1076_v0 = vadd.f32 %v1075_v62, %v1074_v60  ;;  %936 = vmatpush.msra.mxu2 %v904_v46 }
 0x491   :  { %v1077_v1 = vmul.f32 %v1076_v0, %v1066_v49  ;;  %937 = vmatpush.msra.mxu2 %v903_v47  ;;  %v957_v49 = vld [vmem:[%s2651_s20 + $0x70] sm:$0xff] }
 0x492   :  { %964 = vmatpush.msra.mxu3 %v957_v49 }
 0x493   :  { %v1078_v2 = vadd.f32 1e-05, %v1077_v1  ;;  %v948_v1 = vld [vmem:[%s2651_s20 + $0x28] sm:$0xff]  ;;  %1109 = vmatpush.msrb.mxu2 %v1094_v14 }
 0x494   :  { %965 = vmatpush.msra.mxu3 %v956_v50 }
 0x495   :  { %1469 = vrsqrt.f32 %v1078_v2  ;;  %vm1085_vm8 = vweird.f32 %v1078_v2  ;;  %1110 = vmatpush.msrb.mxu2 %v1093_v21 }
 0x496   :  { %966 = vmatpush.msra.mxu3 %v955_v51 }
 0x498   :  { %967 = vmatpush.msra.mxu3 %v954_v53 }
 0x49a   :  { %968 = vmatpush.msra.mxu3 %v953_v55 }
 0x49b   :  { %v1470_v3 = vpop.eup %1469 }
 0x49c   :  { %v1080_v4 = vmul.f32 %v1470_v3, %v1078_v2  ;;  %vm1086_vm7 = vweird.f32 %v1470_v3  ;;  %969 = vmatpush.msra.mxu3 %v952_v57 }
 0x49d   :  { %vm1087_vm9 = vmor %vm1085_vm8, %vm1086_vm7  ;;  %vm1263_vm8 = vcmask 1047936  }
 0x49e   :  { %v1081_v5 = vmul.f32 %v1470_v3, %v1080_v4  ;;  %970 = vmatpush.msra.mxu3 %v951_v59  ;;  %v946_v4 = vld [vmem:[%s2651_s20 + $0x18] sm:$0xff] }
 0x49f   :  { %v1451_v59 = vld [vmem:[#allocation30] ss:$0 sm:$0xff] }
 0x4a0   :  { %v1082_v6 = vmul.f32 0.5, %v1081_v5  ;;  %971 = vmatpush.msra.mxu3 %v950_v61 }
 0x4a2   :  { %v1083_v7 = vsub.f32 1.5, %v1082_v6  ;;  %972 = vmatpush.msra.mxu3 %v949_v63 }
 0x4a4   :  { %v1084_v8 = vmul.f32 %v1470_v3, %v1083_v7  ;;  %973 = vmatpush.msra.mxu3 %v948_v1 }
 0x4a6   :  { %v1088_v9 = vsel %vm1087_vm9, %v1470_v3, %v1084_v8  ;;  %v947_v3 = vld [vmem:[%s2651_s20 + $0x20] sm:$0xff] }
 0x4a7   :  { %v2534_v10 = vmul.f32 %v1088_v9, %v1068_v52  ;;  %v1446_v52 = vld [vmem:[#allocation21] ss:$0 sm:$0xff]  ;;  %974 = vmatpush.msra.mxu3 %v947_v3  ;;  %v945_v9 = vld [vmem:[%s2651_s20 + $0x10] sm:$0xff]  ;;  %v1211_v3 = vld [vmem:[%s2324_s8 + $0x58] sm:$0xff] }
 0x4a9   :  { %1284 = vrot.lane.b32.xlu2 %v2534_v10, %s2153_s3  ;;  %975 = vmatpush.msra.mxu3 %v946_v4  ;;  %v1210_v4 = vld [vmem:[%s2324_s8 + $0x50] sm:$0xff] }
 0x4ab   :  { %976 = vmatpush.msra.mxu3 %v945_v9  ;;  %v1452_v9 = vld [vmem:[#allocation2] ss:$0 sm:$0xff] }
 0x4ad   :  { %977 = vmatpush.msra.mxu3 %v944_v11  ;;  %v1206_v11 = vld [vmem:[%s2324_s8 + $0x30] sm:$0xff] }
 0x4af   :  { %978 = vmatpush.msra.mxu3 %v943_v12  ;;  %v1205_v12 = vld [vmem:[%s2324_s8 + $0x28] sm:$0xff] }
 0x4ce   :  { %v842_v25 = vpop.f32.mrf.mxu0 }
 0x4cf   :  { %v843_v26 = vadd.f32 %v1445_v24, %v842_v25  ;;  %v1090_v24 = vld [vmem:[#allocation32] sm:$0xff]  ;;  %v1448_v25 = vld [vmem:[#allocation26] ss:$0 sm:$0xff] }
 0x4d0   :  { %1133 = vmatpush.msrb.mxu0 %v1090_v24 }
 0x4d1   :  { %v846_v27 = vmul.f32 0.044715, %v843_v26  ;;  %v845_v33 = vmul.f32 0.5, %v843_v26 }
 0x4d3   :  { %v847_v28 = vmul.f32 %v846_v27, %v843_v26 }
 0x4d5   :  { %v848_v29 = vmul.f32 %v847_v28, %v843_v26  ;;  %v1163_v28 = vld [vmem:[%s2652_s26 + $0x58] sm:$0xff] }
 0x4d6   :  { %1175 = vmatpush.msra.mxu1 %v1163_v28 }
 0x4d7   :  { %v849_v30 = vadd.f32 %v848_v29, %v843_v26  ;;  %v1162_v29 = vld [vmem:[%s2652_s26 + $0x50] sm:$0xff] }
 0x4d8   :  { %1176 = vmatpush.msra.mxu1 %v1162_v29 }
 0x4d9   :  { %v850_v31 = vmul.f32 0.7978846, %v849_v30  ;;  %v1161_v30 = vld [vmem:[%s2652_s26 + $0x48] sm:$0xff] }
 0x4da   :  { %1177 = vmatpush.msra.mxu1 %v1161_v30 }
 0x4db   :  { %1471 = vtanh.f32 %v850_v31  ;;  %v1160_v31 = vld [vmem:[%s2652_s26 + $0x40] sm:$0xff] }
 0x4dc   :  { %1178 = vmatpush.msra.mxu1 %v1160_v31 }
 0x4e1   :  { %v1472_v32 = vpop.eup %1471 }
 0x4e2   :  { %v852_v34 = vadd.f32 1.0, %v1472_v32  ;;  %v1159_v32 = vld [vmem:[%s2652_s26 + $0x38] sm:$0xff] }
 0x4e3   :  { %1179 = vmatpush.msra.mxu1 %v1159_v32 }
 0x4e4   :  { %v853_v35 = vmul.f32 %v852_v34, %v845_v33  ;;  %v1158_v33 = vld [vmem:[%s2652_s26 + $0x30] sm:$0xff]  ;;  %v1157_v34 = vld [vmem:[%s2652_s26 + $0x28] sm:$0xff] }
 0x4e5   :  { %1180 = vmatpush.msra.mxu1 %v1158_v33 }
 0x4e6   :  { %890 = vmatmul.f32.vlgmr.msrb.gmra.mxu1 %v853_v35  ;;  %v1156_v35 = vld [vmem:[%s2652_s26 + $0x20] sm:$0xff] }
 0x4e7   :  { %1181 = vmatpush.msra.mxu1 %v1157_v34 }
 0x4e9   :  { %1182 = vmatpush.msra.mxu1 %v1156_v35 }
 0x563   :  { %v891_v54 = vpop.f32.mrf.mxu1 }
 0x564   :  { %v892_v56 = vadd.f32 %v1446_v52, %v891_v54 }
 0x566   :  { %v895_v58 = vmul.f32 0.044715, %v892_v56  ;;  %v894_v6 = vmul.f32 0.5, %v892_v56 }
 0x568   :  { %v896_v60 = vmul.f32 %v895_v58, %v892_v56 }
 0x56a   :  { %v897_v62 = vmul.f32 %v896_v60, %v892_v56 }
 0x56c   :  { %v898_v0 = vadd.f32 %v897_v62, %v892_v56 }
 0x56e   :  { %v899_v2 = vmul.f32 0.7978846, %v898_v0 }
 0x570   :  { %1473 = vtanh.f32 %v899_v2 }
 0x576   :  { %v1474_v5 = vpop.eup %1473 }
 0x577   :  { %v901_v7 = vadd.f32 1.0, %v1474_v5  ;;  %v1209_v5 = vld [vmem:[%s2324_s8 + $0x48] sm:$0xff] }
 0x579   :  { %v2562_v8 = vmul.f32 %v901_v7, %v894_v6  ;;  %v1208_v6 = vld [vmem:[%s2324_s8 + $0x40] sm:$0xff]  ;;  %v1207_v7 = vld [vmem:[%s2324_s8 + $0x38] sm:$0xff] }
 0x57b   :  { %1366 = vmatmul.msk.f32.vlgmr.msra.gmra.mxu2 %vm580_vm1, %v2562_v8 }
 0x57c   :  { %1223 = vmatpush.msra.mxu2 %v1211_v3 }
 0x57e   :  { %1224 = vmatpush.msra.mxu2 %v1210_v4 }
 0x580   :  { %1225 = vmatpush.msra.mxu2 %v1209_v5 }
 0x582   :  { %1226 = vmatpush.msra.mxu2 %v1208_v6 }
 0x584   :  { %1227 = vmatpush.msra.mxu2 %v1207_v7 }
 0x586   :  { %1228 = vmatpush.msra.mxu2 %v1206_v11 }
 0x588   :  { %1229 = vmatpush.msra.mxu2 %v1205_v12 }
 0x58a   :  { %1230 = vmatpush.msra.mxu2 %v1204_v13 }
 0x58c   :  { %1231 = vmatpush.msra.mxu2 %v1203_v15 }
 0x5fe   :  { %v939_v17 = vpop.f32.mrf.mxu2 }
 0x5ff   :  { %v940_v19 = vadd.f32 %v1447_v16, %v939_v17  ;;  %v1202_v17 = vld [vmem:[%s2324_s8 + $0x10] sm:$0xff] }
 0x600   :  { %1232 = vmatpush.msra.mxu2 %v1202_v17 }
 0x601   :  { %v942_v20 = vmax.f32 %v940_v19, 0.0  ;;  %v1201_v19 = vld [vmem:[%s2324_s8 + $0x8] sm:$0xff] }
 0x602   :  { %1233 = vmatpush.msra.mxu2 %v1201_v19 }
 0x603   :  { %979 = vmatmul.f32.vlgmr.msra.gmra.mxu3 %v942_v20  ;;  %v1200_v20 = vld [vmem:[%s2324_s8] sm:$0xff]  ;;  %s2156_s8 = smov 120  }
 0x604   :  { %1234 = vmatpush.msra.mxu2 %v1200_v20 }
 0x686   :  { %v980_v26 = vpop.f32.mrf.mxu3 }
 0x687   :  { %v981_v27 = vadd.f32 %v1448_v25, %v980_v26 }
 0x689   :  { %1279 = vrot.lane.b32.xlu0 %v981_v27, %s2154_s1  ;;  %1367 = vmatmul.msk.f32.vlgmr.msra.gmra.mxu0 %vm477_vm0, %v981_v27 }
 0x68a   :  { %1369 = vmatmul.msk.f32.vlgmr.msrb.gmra.mxu2 %vm477_vm0, %v981_v27 }
 0x691   :  { %1370 = vmatmul.msk.f32.vlgmr.msrb.gmra.mxu0 %vm1052_vm5, %v2534_v10  ;;  %v1155_v10 = vld [vmem:[%s2652_s26 + $0x18] sm:$0xff] }
 0x692   :  { %1183 = vmatpush.msra.mxu1 %v1155_v10 }
 0x694   :  { %1184 = vmatpush.msra.mxu1 %v1154_v36  ;;  %v1285_v36 = vpop.permute.xlu2 %1284 }
 0x696   :  { %1185 = vmatpush.msra.mxu1 %v1153_v38 }
 0x698   :  { %1186 = vmatpush.msra.mxu1 %v1152_v39 }
 0x6fb   :  { %v1280_v10 = vpop.permute.xlu0 %1279 }
 0x706   :  { %v1009_v40 = vpop.f32.mrf.mxu0 }
 0x707   :  { %v1010_v41 = vadd.f32 %v1449_v37, %v1009_v40 }
 0x709   :  { %v1013_v42 = vmul.f32 0.044715, %v1010_v41  ;;  %v1012_v57 = vmul.f32 0.5, %v1010_v41 }
 0x70b   :  { %v1014_v43 = vmul.f32 %v1013_v42, %v1010_v41 }
 0x70d   :  { %v1015_v45 = vmul.f32 %v1014_v43, %v1010_v41  ;;  %v1112_v46 = vpop.f32.mrf.mxu2 }
 0x70e   :  { %v1135_v47 = vpop.f32.mrf.mxu0 }
 0x70f   :  { %v1136_v48 = vadd.f32 %v1135_v47, %v1112_v46  ;;  %v1016_v49 = vadd.f32 %v1015_v45, %v1010_v41 }
 0x711   :  { %v1142_v50 = vadd.f32 %v1450_v44, %v1136_v48  ;;  %v1017_v51 = vmul.f32 0.7978846, %v1016_v49  ;;  %v1454_v48 = vld [vmem:[#allocation38] ss:$0 sm:$0xff] }
 0x713   :  { %v1144_v52 = vmul.f32 0.044715, %v1142_v50  ;;  %1475 = vtanh.f32 %v1017_v51  ;;  %v1143_v0 = vmul.f32 0.5, %v1142_v50 }
 0x715   :  { %v1145_v53 = vmul.f32 %v1144_v52, %v1142_v50 }
 0x717   :  { %v1146_v54 = vmul.f32 %v1145_v53, %v1142_v50 }
 0x719   :  { %v1476_v55 = vpop.eup %1475  ;;  %v1147_v56 = vadd.f32 %v1146_v54, %v1142_v50 }
 0x71a   :  { %v1019_v58 = vadd.f32 1.0, %v1476_v55 }
 0x71b   :  { %v1148_v60 = vmul.f32 0.7978846, %v1147_v56 }
 0x71c   :  { %v1020_v61 = vmul.f32 %v1019_v58, %v1012_v57 }
 0x71d   :  { %1477 = vtanh.f32 %v1148_v60 }
 0x71e   :  { %v1025_v62 = vmul.f32 %v1451_v59, %v1020_v61 }
 0x720   :  { %1026 = vadd.xlane.f32.xlu1 %v1025_v62 }
 0x723   :  { %v1478_v63 = vpop.eup %1477 }
 0x724   :  { %v1150_v1 = vadd.f32 1.0, %v1478_v63 }
 0x726   :  { %v1151_v2 = vmul.f32 %v1150_v1, %v1143_v0 }
 0x728   :  { %1371 = vmatmul.msk.f32.vlgmr.msra.gmra.mxu1 %vm580_vm1, %v1151_v2 }
 0x739   :  { %1272 = vrot.lane.b32.xlu1 %v2562_v8, %s2155_s5 }
 0x793   :  { %v1027_v8 = vpop.xlane.xlu1 %1026 }
 0x794   :  { %v1032_v14 = vadd.f32 %v1452_v9, %v1027_v8 }
 0x796   :  { %v1368_v16 = vmul.f32 -1.442695, %v1032_v14 }
 0x798   :  { %1479 = vpow2.f32 %v1368_v16 }
 0x79e   :  { %v1480_v21 = vpop.eup %1479 }
 0x79f   :  { %v1036_v22 = vadd.f32 1.0, %v1480_v21 }
 0x7a1   :  { %1481 = vrcp.f32 %v1036_v22  ;;  %v1048_v32 = vand.u32 2147483648, %v1036_v22  ;;  %v1046_v35 = vand.u32 2147483647, %v1036_v22  ;;  %vm1042_vm15 = vweird.f32 %v1036_v22 }
 0x7a3   :  { %v1049_v39 = vor.u32 1.1754944e-38, %v1048_v32  ;;  %vm1047_vm3 = vcmp.eq.f32.partialorder %v1046_v35, 8.507059e+37 }
 0x7a5   :  { %v1188_v24 = vpop.f32.mrf.mxu1 }
 0x7a6   :  { %v1189_v25 = vadd.f32 %v1453_v23, %v1188_v24 }
 0x7a7   :  { %v1482_v26 = vpop.eup %1481 }
 0x7a8   :  { %v1192_v27 = vmul.f32 0.044715, %v1189_v25  ;;  %v1038_v28 = vmul.f32 %v1482_v26, %v1036_v22  ;;  %vm1043_vm14 = vweird.f32 %v1482_v26  ;;  %v1191_v44 = vmul.f32 0.5, %v1189_v25 }
 0x7a9   :  { %vm1044_vm0 = vmor %vm1042_vm15, %vm1043_vm14 }
 0x7aa   :  { %v1193_v29 = vmul.f32 %v1192_v27, %v1189_v25  ;;  %v1039_v30 = vsub.f32 1.0, %v1038_v28 }
 0x7ab   :  { %v1273_v31 = vpop.permute.xlu1 %1272 }
 0x7ac   :  { %v1194_v33 = vmul.f32 %v1193_v29, %v1189_v25  ;;  %1276 = vst.msk [vmem:[#allocation39 + $0x8] sm:$0xff] %vm1275_vm10, %v1273_v31  ;;  %v1040_v34 = vmul.f32 %v1482_v26, %v1039_v30 }
 0x7ad   :  { %1278 = vst.msk [vmem:[#allocation39 + $0x10] sm:$0xff] %vm1277_vm11, %v1273_v31 }
 0x7ae   :  { %v1195_v37 = vadd.f32 %v1194_v33, %v1189_v25  ;;  %1283 = vst.msk [vmem:[#allocation39 + $0x10] sm:$0xff] %vm1282_vm12, %v1280_v10  ;;  %v1041_v38 = vadd.f32 %v1482_v26, %v1040_v34 }
 0x7af   :  { %1288 = vst.msk [vmem:[#allocation39 + $0x10] sm:$0xff] %vm1287_vm13, %v1285_v36 }
 0x7b0   :  { %v1196_v40 = vmul.f32 0.7978846, %v1195_v37  ;;  %v1045_v41 = vsel %vm1044_vm0, %v1482_v26, %v1041_v38 }
 0x7b1   :  { %v1050_v42 = vsel %vm1047_vm3, %v1049_v39, %v1045_v41 }
 0x7b2   :  { %1483 = vtanh.f32 %v1196_v40  ;;  %1290 = vrot.lane.b32.xlu0 %v1050_v42, %s2156_s8 }
 0x7b8   :  { %v1484_v43 = vpop.eup %1483 }
 0x7b9   :  { %v1198_v45 = vadd.f32 1.0, %v1484_v43 }
 0x7bb   :  { %v1199_v46 = vmul.f32 %v1198_v45, %v1191_v44 }
 0x7bd   :  { %1372 = vmatmul.msk.f32.vlgmr.msra.gmra.mxu2 %vm580_vm1, %v1199_v46 }
 0x824   :  { %v1291_v47 = vpop.permute.xlu0 %1290 }
 0x825   :  { %1294 = vst.msk [vmem:[#allocation39 + $0x10] sm:$0xff] %vm1293_vm4, %v1291_v47 }
 0x840   :  { %v1236_v49 = vpop.f32.mrf.mxu2 }
 0x841   :  { %v1237_v50 = vadd.f32 %v1454_v48, %v1236_v49 }
 0x843   :  { %v1373_v51 = vmul.f32 -1.442695, %v1237_v50 }
 0x845   :  { %1485 = vpow2.f32 %v1373_v51 }
 0x84b   :  { %v1486_v52 = vpop.eup %1485 }
 0x84c   :  { %v1242_v53 = vadd.f32 1.0, %v1486_v52 }
 0x84e   :  { %1487 = vrcp.f32 %v1242_v53  ;;  %v1254_v57 = vand.u32 2147483648, %v1242_v53  ;;  %v1252_v59 = vand.u32 2147483647, %v1242_v53  ;;  %vm1248_vm1 = vweird.f32 %v1242_v53 }
 0x850   :  { %v1255_v61 = vor.u32 1.1754944e-38, %v1254_v57  ;;  %vm1253_vm7 = vcmp.eq.f32.partialorder %v1252_v59, 8.507059e+37 }
 0x854   :  { %v1488_v54 = vpop.eup %1487 }
 0x855   :  { %v1244_v55 = vmul.f32 %v1488_v54, %v1242_v53  ;;  %vm1249_vm5 = vweird.f32 %v1488_v54 }
 0x856   :  { %vm1250_vm6 = vmor %vm1248_vm1, %vm1249_vm5 }
 0x857   :  { %v1245_v56 = vsub.f32 1.0, %v1244_v55 }
 0x859   :  { %v1246_v58 = vmul.f32 %v1488_v54, %v1245_v56 }
 0x85b   :  { %v1247_v60 = vadd.f32 %v1488_v54, %v1246_v58 }
 0x85d   :  { %v1251_v62 = vsel %vm1250_vm6, %v1488_v54, %v1247_v60 }
 0x85e   :  { %v1256_v63 = vsel %vm1253_vm7, %v1255_v61, %v1251_v62 }
 0x85f   :  { %1259 = vst.msk [vmem:[#allocation39] sm:$0xff] %vm1258_vm2, %v1256_v63 }
 0x860   :  { %1264 = vst.msk [vmem:[#allocation39] sm:$0xff] %vm1263_vm8, %v2521_v18 }
 0x861   :  { %2064 = shalt.err (!%p2061_p7)
}
 0x862   :  { %1305 = dma.vmem_to_hbm [thread:$0]  %s1301_s2, 384, %s1303_s29, [#allocation5]  }
 0x863   :  { %2089 = dma.done.wait [#allocation5], 384  }
 0x864   :  { %2090 = vsyncadd [#allocation5], 4294966912 }
 0x865   :  { %1310 = vsyncpa [#allocation4], 1 }
 0x866   :  { %1311 = vsyncpa [#allocation7], 1 }
 0x867   :  { %1312 = vsyncpa [#allocation10], 1 }
 0x868   :  { %1313 = vsyncpa [#allocation13], 1 }
 0x869   :  { %1314 = vsyncpa [#allocation16], 1 }
 0x86a   :  { %1315 = vsyncpa [#allocation19], 1 }
 0x86b   :  { %1316 = vsyncpa [#allocation22], 1 }
 0x86c   :  { %1317 = vsyncpa [#allocation25], 1 }
 0x86d   :  { %1318 = vsyncpa [#allocation28], 1 }
 0x86e   :  { %1319 = vsyncpa [#allocation31], 1 }
 0x86f   :  { %1320 = vsyncpa [#allocation34], 1 }
 0x870   :  { %1321 = vsyncpa [#allocation37], 1 }
 0x871   :  { %1322 = vsyncpa [#allocation5], 1 }

</bundles_post_ra>
